<compile_context>
chip_gen: v7x
topology: tpu7x:2x2x1
jax: 0.10.0
libtpu: 0.0.40
codegen_flags: <defaults>
</compile_context>

<pallas_src>
import functools

import jax
import jax.numpy as jnp
from jax.experimental import pallas as pl
from jax.experimental.pallas import tpu as pltpu

NEG_SLOPE = 0.01
VMEM = pltpu.MemorySpace.VMEM
SMEM = pltpu.MemorySpace.SMEM


def _leaky(x):
    return jnp.where(x > 0, x, NEG_SLOPE * x)


# ==========================================================================
# Fused AWN forward kernel (gridless; everything lives in VMEM / registers).
#
# Inputs (all full-array VMEM blocks):
#   xin   : (B, T+3, 4)  zero-padded, parity-paired input
#                        column q = 2*s + r  ->  padded row 2p+s, input row r
#   w1    : (16, 2C)     paired conv1 weights (bf16)
#   w2    : (6C, 2C)     paired conv2 weights (bf16)
#   s1/h1, s2/h2 : (1, 2C) folded BatchNorm scale/shift (f32)
#   uw*/pw* : (3C, C)    lifting operator conv weights (bf16), ub*/pb*: (1, C)
#   se1t/se2t, fc1t/fc2t : head weights (bf16), fcb1/fcb2: (1, ·) biases (f32)
# Outputs:
#   logits : (B, ncls) f32 (VMEM)
#   regu   : (1, 1)    f32 (SMEM scalar)
# ==========================================================================
def _awn_fused_kernel(rd, ra, K,
                      xin_ref, w1_ref, s1_ref, h1_ref, w2_ref, s2_ref, h2_ref,
                      uw1_ref, ub1_ref, uw2_ref, ub2_ref,
                      pw1_ref, pb1_ref, pw2_ref, pb2_ref,
                      se1_ref, se2_ref, fc1_ref, fcb1_ref, fc2_ref, fcb2_ref,
                      logit_ref, regu_ref):
    B = xin_ref.shape[0]
    T = xin_ref.shape[1] - 3          # conv1 pad = 3 -> (W + 6)/2 = T + 3 pairs
    C2 = w1_ref.shape[1]              # 2 * in_channels (lane-dense, 128)
    C = C2 // 2
    p_refl = (K - 1) // 2 + 1         # ReflectionPad1d width inside Operator

    # ---- hoisted weight loads (once per kernel invocation) ----
    w1 = w1_ref[...]
    w2 = w2_ref[...]
    s1 = s1_ref[...]
    h1 = h1_ref[...]
    s2 = s2_ref[...]
    h2 = h2_ref[...]
    uw1 = uw1_ref[...]
    ub1 = ub1_ref[...]
    uw2 = uw2_ref[...]
    ub2 = ub2_ref[...]
    pw1 = pw1_ref[...]
    pb1 = pb1_ref[...]
    pw2 = pw2_ref[...]
    pb2 = pb2_ref[...]

    def matmul(a, w):
        # bf16 MXU operands, f32 accumulation; elementwise math stays f32.
        return jnp.dot(a.astype(w.dtype), w, preferred_element_type=jnp.float32)

    def im2col(v, ntaps, length):
        # v: (L, F) -> (length, ntaps*F), tap-major on the lane axis.
        return jnp.concatenate([v[k:k + length, :] for k in range(ntaps)], axis=1)

    def reflect_pad(v):
        # nn.ReflectionPad1d(p_refl) along time, built purely in registers.
        Tv = v.shape[0]
        left = [v[p_refl - q:p_refl - q + 1, :] for q in range(p_refl)]
        right = [v[Tv - 2 - q:Tv - 1 - q, :] for q in range(p_refl)]
        return jnp.concatenate(left + [v] + right, axis=0)

    def operator(v, wa, ba, wb, bb):
        # Conv1d(C,C,K) + LeakyReLU + Dropout(0) + Conv1d(C,C,K) + Tanh
        vp = reflect_pad(v)                              # (T + 2*p_refl, C)
        l1 = vp.shape[0] - (K - 1)
        h = _leaky(matmul(im2col(vp, K, l1), wa) + ba)
        # TODO(synk): Dropout inside Operator is identity (p=0.0 / eval mode).
        l2 = l1 - (K - 1)
        return jnp.tanh(matmul(im2col(h, K, l2), wb) + bb)

    zrow = jnp.zeros((1, C2), jnp.float32)

    sum_abs_d = 0.0
    sum_c = 0.0
    sum_x2 = 0.0
    feats = []

    # TODO(synk): at production batch sizes replace this unrolled loop with a
    # "parallel" grid axis; at B=2 a gridless single dispatch is cheaper.
    for b in range(B):
        xin_b = xin_ref[b]                               # (T+3, 4)

        # conv1 + BN2d + LeakyReLU; output row u = [x1[2u] || x1[2u+1]]
        x1 = _leaky(matmul(im2col(xin_b, 4, T), w1) * s1 + h1)      # (T, 2C)

        # conv2 (padding=2 folded into one zero pair-row each side) + BN1d + LeakyReLU
        x1p = jnp.concatenate([zrow, x1, zrow], axis=0)             # (T+2, 2C)
        x2 = _leaky(matmul(im2col(x1p, 3, T), w2) * s2 + h2)        # (T, 2C)

        # Splitting(): even/odd are just lane slices of the paired layout.
        xe = x2[:, :C]
        xo = x2[:, C:]

        # Lifting scheme: c = x_even + U(x_odd);  d = x_odd - P(c)
        c = xe + operator(xo, uw1, ub1, uw2, ub2)
        d = xo - operator(c, pw1, pb1, pw2, pb2)

        sum_abs_d = sum_abs_d + jnp.sum(jnp.abs(d))
        sum_c = sum_c + jnp.sum(c)
        sum_x2 = sum_x2 + jnp.sum(x2)

        # AdaptiveAvgPool1d(1): details first, then approximation.
        feats.append(jnp.concatenate(
            [jnp.mean(d, axis=0, keepdims=True),
             jnp.mean(c, axis=0, keepdims=True)], axis=1))          # (1, 2C)

    # ---- regularization: rd*mean|d| + ra*|mean(c) - mean(conv2 out)| ----
    n = float(B * T * C)
    regu = rd * (sum_abs_d / n) + ra * jnp.abs(sum_c / n - sum_x2 / (2.0 * n))
    regu_ref[0, 0] = regu

    # ---- SE attention + classifier head (batched 2D matmuls) ----
    feat = jnp.concatenate(feats, axis=0)                           # (B, 2C)
    s = jnp.maximum(matmul(feat, se1_ref[...]), 0.0)                # Dropout(0.5) is
    s = matmul(s, se2_ref[...])                                     # identity in eval
    # TODO(synk): approx-reciprocal sigmoid; set approx=False for strict parity.
    s = pl.reciprocal(1.0 + jnp.exp(-s), approx=True)
    y = s * feat

    hfc = _leaky(matmul(y, fc1_ref[...]) + fcb1_ref[...])
    logit_ref[...] = matmul(hfc, fc2_ref[...]) + fcb2_ref[...]


# ==========================================================================
# Parameter init (PyTorch layouts) and one-time kernel-ready layout prep
# ==========================================================================
def _bn_affine(gamma, beta, mean, var, eps=1e-5):
    scale = gamma / jnp.sqrt(var + eps)
    shift = beta - mean * scale
    return scale, shift


def init_params(key, in_channels=64, kernel_size=3, latent_dim=256, num_classes=10):
    C = in_channels
    OC = 2 * C  # out_channels with num_levels = 1
    ks = jax.random.split(key, 20)

    def nrm(k, shape, s=0.1):
        return s * jax.random.normal(k, shape, jnp.float32)

    return {
        'conv1_w': nrm(ks[0], (C, 1, 2, 7)),
        'bn1_gamma': 1.0 + nrm(ks[1], (C,), 0.05),
        'bn1_beta': nrm(ks[2], (C,), 0.05),
        'bn1_mean': jnp.zeros((C,), jnp.float32),
        'bn1_var': jnp.ones((C,), jnp.float32),
        'conv2_w': nrm(ks[3], (C, C, 5), 0.05),
        'bn2_gamma': 1.0 + nrm(ks[4], (C,), 0.05),
        'bn2_beta': nrm(ks[5], (C,), 0.05),
        'bn2_mean': jnp.zeros((C,), jnp.float32),
        'bn2_var': jnp.ones((C,), jnp.float32),
        'U_w1': nrm(ks[6], (C, C, kernel_size), 0.05),
        'U_b1': nrm(ks[7], (C,), 0.05),
        'U_w2': nrm(ks[8], (C, C, kernel_size), 0.05),
        'U_b2': nrm(ks[9], (C,), 0.05),
        'P_w1': nrm(ks[10], (C, C, kernel_size), 0.05),
        'P_b1': nrm(ks[11], (C,), 0.05),
        'P_w2': nrm(ks[12], (C, C, kernel_size), 0.05),
        'P_b2': nrm(ks[13], (C,), 0.05),
        'se_w1': nrm(ks[14], (OC // 4, OC), 0.1),
        'se_w2': nrm(ks[15], (OC, OC // 4), 0.1),
        'fc_w1': nrm(ks[16], (latent_dim, OC), 0.05),
        'fc_b1': nrm(ks[17], (latent_dim,), 0.05),
        'fc_w2': nrm(ks[18], (num_classes, latent_dim), 0.05),
        'fc_b2': nrm(ks[19], (num_classes,), 0.05),
    }


def prepare_params(p, mxu_dtype=jnp.bfloat16):
    """One-time weight prep: paired im2col conv weights, BN folding, transposes.

    "Paired" conv weights map the im2col window of consecutive time-PAIRS to
    [even-output || odd-output] channel blocks so each conv is a single matmul
    whose output is already split into even/odd along the lane axis.
    """
    C = p['conv1_w'].shape[0]
    C2 = 2 * C
    s1, h1 = _bn_affine(p['bn1_gamma'], p['bn1_beta'], p['bn1_mean'], p['bn1_var'])
    s2, h2 = _bn_affine(p['bn2_gamma'], p['bn2_beta'], p['bn2_mean'], p['bn2_var'])

    # conv1 (C,1,2,7) -> per-tap (7, 2, C) -> paired (16, 2C)
    w1_taps = jnp.transpose(p['conv1_w'][:, 0], (2, 1, 0))
    z12 = jnp.zeros((1, 2, C), jnp.float32)
    w1e = jnp.concatenate([w1_taps, z12], axis=0).reshape(16, C)
    w1o = jnp.concatenate([z12, w1_taps], axis=0).reshape(16, C)
    w1_pair = jnp.concatenate([w1e, w1o], axis=1).astype(mxu_dtype)

    # conv2 (C,C,5) -> per-tap (5, C_in, C_out) -> paired (6C, 2C)
    w2_taps = jnp.transpose(p['conv2_w'], (2, 1, 0))
    zcc = jnp.zeros((1, C, C), jnp.float32)
    w2e = jnp.concatenate([w2_taps, zcc], axis=0).reshape(6 * C, C)
    w2o = jnp.concatenate([zcc, w2_taps], axis=0).reshape(6 * C, C)
    w2_pair = jnp.concatenate([w2e, w2o], axis=1).astype(mxu_dtype)

    def op_flat(w):  # (C_out, C_in, K) -> (K*C_in, C_out) for im2col matmul
        K = w.shape[2]
        return jnp.transpose(w, (2, 1, 0)).reshape(K * C, C).astype(mxu_dtype)

    def dup(v):      # per-channel BN vector -> paired (1, 2C)
        return jnp.concatenate([v, v]).reshape(1, C2)

    return {
        'w1': w1_pair, 's1': dup(s1), 'h1': dup(h1),
        'w2': w2_pair, 's2': dup(s2), 'h2': dup(h2),
        'uw1': op_flat(p['U_w1']), 'ub1': p['U_b1'].reshape(1, C),
        'uw2': op_flat(p['U_w2']), 'ub2': p['U_b2'].reshape(1, C),
        'pw1': op_flat(p['P_w1']), 'pb1': p['P_b1'].reshape(1, C),
        'pw2': op_flat(p['P_w2']), 'pb2': p['P_b2'].reshape(1, C),
        'se1t': p['se_w1'].T.astype(mxu_dtype),
        'se2t': p['se_w2'].T.astype(mxu_dtype),
        'fc1t': p['fc_w1'].T.astype(mxu_dtype), 'fcb1': p['fc_b1'].reshape(1, -1),
        'fc2t': p['fc_w2'].T.astype(mxu_dtype), 'fcb2': p['fc_b2'].reshape(1, -1),
    }


# ==========================================================================
# AWN forward (num_levels = 1)
# ==========================================================================
def awn_forward(x, prep, kernel_size=3, regu_details=0.01, regu_approx=0.01):
    B = x.shape[0]
    W = x.shape[3]
    assert W % 2 == 0, "time length must be even (Splitting + paired layout)"
    T = W // 2
    ncls = prep['fc2t'].shape[1]

    # Tiny input regroup (one fused XLA op, <1 KB):
    # NCHW (B,1,2,W) -> time-major (B,W,2) -> zero-pad 3 -> pairs (B, T+3, 4).
    xt = jnp.transpose(x[:, 0], (0, 2, 1))
    xp = jnp.pad(xt, ((0, 0), (3, 3), (0, 0)))
    xin_pair = xp.reshape(B, T + 3, 4)

    args = (xin_pair,
            prep['w1'], prep['s1'], prep['h1'],
            prep['w2'], prep['s2'], prep['h2'],
            prep['uw1'], prep['ub1'], prep['uw2'], prep['ub2'],
            prep['pw1'], prep['pb1'], prep['pw2'], prep['pb2'],
            prep['se1t'], prep['se2t'],
            prep['fc1t'], prep['fcb1'], prep['fc2t'], prep['fcb2'])

    logits, regu = pl.pallas_call(
        functools.partial(_awn_fused_kernel,
                          float(regu_details), float(regu_approx), kernel_size),
        out_shape=(jax.ShapeDtypeStruct((B, ncls), jnp.float32),
                   jax.ShapeDtypeStruct((1, 1), jnp.float32)),
        in_specs=[pl.BlockSpec(memory_space=VMEM)] * len(args),
        out_specs=(pl.BlockSpec(memory_space=VMEM),
                   pl.BlockSpec(memory_space=SMEM)),
    )(*args)

    return logits, [regu[0, 0]]


if __name__ == "__main__":
    key = jax.random.PRNGKey(0)
    kp, kx = jax.random.split(key)

    num_classes = 10
    raw_params = init_params(kp, in_channels=64, kernel_size=3,
                             latent_dim=256, num_classes=num_classes)
    prep = prepare_params(raw_params)   # hoisted, executed once

    # Input: NCHW (B=2, C=1, H=2, W=16) -- H=2 so conv1's (2,7) kernel reduces it to 1.
    x = jax.random.normal(kx, (2, 1, 2, 16), jnp.float32)

    fwd = jax.jit(awn_forward)
    logits, regu_sum = fwd(x, prep)
    jax.block_until_ready(logits)
    jax.block_until_ready(regu_sum[0])

    assert logits.shape == (2, num_classes)
    assert regu_sum[0].shape == ()
    print("KERNEL_OK")
</pallas_src>

<mosaic_0001>
module attributes {stable_mosaic.version = 11 : i64} {
  func.func @_awn_fused_kernel(%arg0: memref<2x11x4xf32, #tpu.memory_space<vmem>>, %arg1: memref<16x128xbf16, #tpu.memory_space<vmem>>, %arg2: memref<1x128xf32, #tpu.memory_space<vmem>>, %arg3: memref<1x128xf32, #tpu.memory_space<vmem>>, %arg4: memref<384x128xbf16, #tpu.memory_space<vmem>>, %arg5: memref<1x128xf32, #tpu.memory_space<vmem>>, %arg6: memref<1x128xf32, #tpu.memory_space<vmem>>, %arg7: memref<192x64xbf16, #tpu.memory_space<vmem>>, %arg8: memref<1x64xf32, #tpu.memory_space<vmem>>, %arg9: memref<192x64xbf16, #tpu.memory_space<vmem>>, %arg10: memref<1x64xf32, #tpu.memory_space<vmem>>, %arg11: memref<192x64xbf16, #tpu.memory_space<vmem>>, %arg12: memref<1x64xf32, #tpu.memory_space<vmem>>, %arg13: memref<192x64xbf16, #tpu.memory_space<vmem>>, %arg14: memref<1x64xf32, #tpu.memory_space<vmem>>, %arg15: memref<128x32xbf16, #tpu.memory_space<vmem>>, %arg16: memref<32x128xbf16, #tpu.memory_space<vmem>>, %arg17: memref<128x256xbf16, #tpu.memory_space<vmem>>, %arg18: memref<1x256xf32, #tpu.memory_space<vmem>>, %arg19: memref<256x10xbf16, #tpu.memory_space<vmem>>, %arg20: memref<1x10xf32, #tpu.memory_space<vmem>>, %arg21: memref<2x10xf32, #tpu.memory_space<vmem>>, %arg22: memref<1x1xf32, #tpu.memory_space<smem>>) attributes {dimension_semantics = [], scalar_prefetch = 0 : i64, scratch_operands = 0 : i64, tpu.core_type = #tpu.core_type<tc>} {
    %c0 = arith.constant 0 : index
    %c0_0 = arith.constant 0 : index
    %0 = vector.load %arg1[%c0, %c0_0] : memref<16x128xbf16, #tpu.memory_space<vmem>>, vector<16x128xbf16>
    %c0_1 = arith.constant 0 : index
    %c0_2 = arith.constant 0 : index
    %1 = vector.load %arg4[%c0_1, %c0_2] : memref<384x128xbf16, #tpu.memory_space<vmem>>, vector<384x128xbf16>
    %c0_3 = arith.constant 0 : index
    %c0_4 = arith.constant 0 : index
    %2 = vector.load %arg2[%c0_3, %c0_4] : memref<1x128xf32, #tpu.memory_space<vmem>>, vector<1x128xf32>
    %c0_5 = arith.constant 0 : index
    %c0_6 = arith.constant 0 : index
    %3 = vector.load %arg3[%c0_5, %c0_6] : memref<1x128xf32, #tpu.memory_space<vmem>>, vector<1x128xf32>
    %c0_7 = arith.constant 0 : index
    %c0_8 = arith.constant 0 : index
    %4 = vector.load %arg5[%c0_7, %c0_8] : memref<1x128xf32, #tpu.memory_space<vmem>>, vector<1x128xf32>
    %c0_9 = arith.constant 0 : index
    %c0_10 = arith.constant 0 : index
    %5 = vector.load %arg6[%c0_9, %c0_10] : memref<1x128xf32, #tpu.memory_space<vmem>>, vector<1x128xf32>
    %c0_11 = arith.constant 0 : index
    %c0_12 = arith.constant 0 : index
    %6 = vector.load %arg7[%c0_11, %c0_12] : memref<192x64xbf16, #tpu.memory_space<vmem>>, vector<192x64xbf16>
    %c0_13 = arith.constant 0 : index
    %c0_14 = arith.constant 0 : index
    %7 = vector.load %arg8[%c0_13, %c0_14] : memref<1x64xf32, #tpu.memory_space<vmem>>, vector<1x64xf32>
    %c0_15 = arith.constant 0 : index
    %c0_16 = arith.constant 0 : index
    %8 = vector.load %arg9[%c0_15, %c0_16] : memref<192x64xbf16, #tpu.memory_space<vmem>>, vector<192x64xbf16>
    %c0_17 = arith.constant 0 : index
    %c0_18 = arith.constant 0 : index
    %9 = vector.load %arg10[%c0_17, %c0_18] : memref<1x64xf32, #tpu.memory_space<vmem>>, vector<1x64xf32>
    %c0_19 = arith.constant 0 : index
    %c0_20 = arith.constant 0 : index
    %10 = vector.load %arg11[%c0_19, %c0_20] : memref<192x64xbf16, #tpu.memory_space<vmem>>, vector<192x64xbf16>
    %c0_21 = arith.constant 0 : index
    %c0_22 = arith.constant 0 : index
    %11 = vector.load %arg12[%c0_21, %c0_22] : memref<1x64xf32, #tpu.memory_space<vmem>>, vector<1x64xf32>
    %c0_23 = arith.constant 0 : index
    %c0_24 = arith.constant 0 : index
    %12 = vector.load %arg13[%c0_23, %c0_24] : memref<192x64xbf16, #tpu.memory_space<vmem>>, vector<192x64xbf16>
    %c0_25 = arith.constant 0 : index
    %c0_26 = arith.constant 0 : index
    %13 = vector.load %arg14[%c0_25, %c0_26] : memref<1x64xf32, #tpu.memory_space<vmem>>, vector<1x64xf32>
    %cst = arith.constant 0.000000e+00 : f32
    %14 = vector.broadcast %cst : f32 to vector<1x128xf32>
    %c0_27 = arith.constant 0 : index
    %c0_28 = arith.constant 0 : index
    %c0_29 = arith.constant 0 : index
    %15 = vector.load %arg0[%c0_27, %c0_28, %c0_29] : memref<2x11x4xf32, #tpu.memory_space<vmem>>, vector<1x11x4xf32>
    %16 = vector.shape_cast %15 : vector<1x11x4xf32> to vector<11x4xf32>
    %17 = vector.extract_strided_slice %16 {offsets = [0, 0], sizes = [8, 4], strides = [1, 1]} : vector<11x4xf32> to vector<8x4xf32>
    %18 = vector.extract_strided_slice %16 {offsets = [1, 0], sizes = [8, 4], strides = [1, 1]} : vector<11x4xf32> to vector<8x4xf32>
    %19 = vector.extract_strided_slice %16 {offsets = [2, 0], sizes = [8, 4], strides = [1, 1]} : vector<11x4xf32> to vector<8x4xf32>
    %20 = vector.extract_strided_slice %16 {offsets = [3, 0], sizes = [8, 4], strides = [1, 1]} : vector<11x4xf32> to vector<8x4xf32>
    %21 = tpu.concatenate %17, %18, %19, %20 in 1 : vector<8x4xf32>, vector<8x4xf32>, vector<8x4xf32>, vector<8x4xf32> -> vector<8x16xf32>
    %22 = arith.truncf %21 : vector<8x16xf32> to vector<8x16xbf16>
    %cst_30 = arith.constant dense<0.000000e+00> : vector<8x128xf32>
    %23 = tpu.matmul %22, %0, %cst_30 {dimension_numbers = #tpu.dot_dimension_numbers<[1], [0], [0], [1], [0, 0, 1, 1], [], []>} : vector<8x16xbf16>, vector<16x128xbf16>, vector<8x128xf32> -> vector<8x128xf32>
    %24 = vector.broadcast %2 : vector<1x128xf32> to vector<8x128xf32>
    %25 = arith.mulf %23, %24 : vector<8x128xf32>
    %26 = vector.broadcast %3 : vector<1x128xf32> to vector<8x128xf32>
    %27 = arith.addf %25, %26 : vector<8x128xf32>
    %cst_31 = arith.constant 0.000000e+00 : f32
    %28 = vector.broadcast %cst_31 : f32 to vector<8x128xf32>
    %29 = arith.cmpf ogt, %27, %28 : vector<8x128xf32>
    %cst_32 = arith.constant 0.00999999977 : f32
    %30 = vector.broadcast %cst_32 : f32 to vector<8x128xf32>
    %31 = arith.mulf %30, %27 : vector<8x128xf32>
    %32 = arith.select %29, %27, %31 : vector<8x128xi1>, vector<8x128xf32>
    %33 = tpu.concatenate %14, %32, %14 in 0 : vector<1x128xf32>, vector<8x128xf32>, vector<1x128xf32> -> vector<10x128xf32>
    %34 = vector.extract_strided_slice %33 {offsets = [0, 0], sizes = [8, 128], strides = [1, 1]} : vector<10x128xf32> to vector<8x128xf32>
    %35 = vector.extract_strided_slice %33 {offsets = [1, 0], sizes = [8, 128], strides = [1, 1]} : vector<10x128xf32> to vector<8x128xf32>
    %36 = vector.extract_strided_slice %33 {offsets = [2, 0], sizes = [8, 128], strides = [1, 1]} : vector<10x128xf32> to vector<8x128xf32>
    %37 = tpu.concatenate %34, %35, %36 in 1 : vector<8x128xf32>, vector<8x128xf32>, vector<8x128xf32> -> vector<8x384xf32>
    %38 = arith.truncf %37 : vector<8x384xf32> to vector<8x384xbf16>
    %cst_33 = arith.constant dense<0.000000e+00> : vector<8x128xf32>
    %39 = tpu.matmul %38, %1, %cst_33 {dimension_numbers = #tpu.dot_dimension_numbers<[1], [0], [0], [1], [0, 0, 1, 1], [], []>} : vector<8x384xbf16>, vector<384x128xbf16>, vector<8x128xf32> -> vector<8x128xf32>
    %40 = vector.broadcast %4 : vector<1x128xf32> to vector<8x128xf32>
    %41 = arith.mulf %39, %40 : vector<8x128xf32>
    %42 = vector.broadcast %5 : vector<1x128xf32> to vector<8x128xf32>
    %43 = arith.addf %41, %42 : vector<8x128xf32>
    %cst_34 = arith.constant 0.000000e+00 : f32
    %44 = vector.broadcast %cst_34 : f32 to vector<8x128xf32>
    %45 = arith.cmpf ogt, %43, %44 : vector<8x128xf32>
    %cst_35 = arith.constant 0.00999999977 : f32
    %46 = vector.broadcast %cst_35 : f32 to vector<8x128xf32>
    %47 = arith.mulf %46, %43 : vector<8x128xf32>
    %48 = arith.select %45, %43, %47 : vector<8x128xi1>, vector<8x128xf32>
    %49 = vector.extract_strided_slice %48 {offsets = [0, 0], sizes = [8, 64], strides = [1, 1]} : vector<8x128xf32> to vector<8x64xf32>
    %50 = vector.extract_strided_slice %48 {offsets = [0, 64], sizes = [8, 64], strides = [1, 1]} : vector<8x128xf32> to vector<8x64xf32>
    %51 = vector.extract_strided_slice %50 {offsets = [2, 0], sizes = [1, 64], strides = [1, 1]} : vector<8x64xf32> to vector<1x64xf32>
    %52 = vector.extract_strided_slice %50 {offsets = [1, 0], sizes = [1, 64], strides = [1, 1]} : vector<8x64xf32> to vector<1x64xf32>
    %53 = vector.extract_strided_slice %50 {offsets = [6, 0], sizes = [1, 64], strides = [1, 1]} : vector<8x64xf32> to vector<1x64xf32>
    %54 = vector.extract_strided_slice %50 {offsets = [5, 0], sizes = [1, 64], strides = [1, 1]} : vector<8x64xf32> to vector<1x64xf32>
    %55 = tpu.concatenate %51, %52, %50, %53, %54 in 0 : vector<1x64xf32>, vector<1x64xf32>, vector<8x64xf32>, vector<1x64xf32>, vector<1x64xf32> -> vector<12x64xf32>
    %56 = vector.extract_strided_slice %55 {offsets = [0, 0], sizes = [10, 64], strides = [1, 1]} : vector<12x64xf32> to vector<10x64xf32>
    %57 = vector.extract_strided_slice %55 {offsets = [1, 0], sizes = [10, 64], strides = [1, 1]} : vector<12x64xf32> to vector<10x64xf32>
    %58 = vector.extract_strided_slice %55 {offsets = [2, 0], sizes = [10, 64], strides = [1, 1]} : vector<12x64xf32> to vector<10x64xf32>
    %59 = tpu.concatenate %56, %57, %58 in 1 : vector<10x64xf32>, vector<10x64xf32>, vector<10x64xf32> -> vector<10x192xf32>
    %60 = arith.truncf %59 : vector<10x192xf32> to vector<10x192xbf16>
    %cst_36 = arith.constant dense<0.000000e+00> : vector<10x64xf32>
    %61 = tpu.matmul %60, %6, %cst_36 {dimension_numbers = #tpu.dot_dimension_numbers<[1], [0], [0], [1], [0, 0, 1, 1], [], []>} : vector<10x192xbf16>, vector<192x64xbf16>, vector<10x64xf32> -> vector<10x64xf32>
    %62 = vector.broadcast %7 : vector<1x64xf32> to vector<10x64xf32>
    %63 = arith.addf %61, %62 : vector<10x64xf32>
    %cst_37 = arith.constant 0.000000e+00 : f32
    %64 = vector.broadcast %cst_37 : f32 to vector<10x64xf32>
    %65 = arith.cmpf ogt, %63, %64 : vector<10x64xf32>
    %cst_38 = arith.constant 0.00999999977 : f32
    %66 = vector.broadcast %cst_38 : f32 to vector<10x64xf32>
    %67 = arith.mulf %66, %63 : vector<10x64xf32>
    %68 = arith.select %65, %63, %67 : vector<10x64xi1>, vector<10x64xf32>
    %69 = vector.extract_strided_slice %68 {offsets = [0, 0], sizes = [8, 64], strides = [1, 1]} : vector<10x64xf32> to vector<8x64xf32>
    %70 = vector.extract_strided_slice %68 {offsets = [1, 0], sizes = [8, 64], strides = [1, 1]} : vector<10x64xf32> to vector<8x64xf32>
    %71 = vector.extract_strided_slice %68 {offsets = [2, 0], sizes = [8, 64], strides = [1, 1]} : vector<10x64xf32> to vector<8x64xf32>
    %72 = tpu.concatenate %69, %70, %71 in 1 : vector<8x64xf32>, vector<8x64xf32>, vector<8x64xf32> -> vector<8x192xf32>
    %73 = arith.truncf %72 : vector<8x192xf32> to vector<8x192xbf16>
    %cst_39 = arith.constant dense<0.000000e+00> : vector<8x64xf32>
    %74 = tpu.matmul %73, %8, %cst_39 {dimension_numbers = #tpu.dot_dimension_numbers<[1], [0], [0], [1], [0, 0, 1, 1], [], []>} : vector<8x192xbf16>, vector<192x64xbf16>, vector<8x64xf32> -> vector<8x64xf32>
    %75 = vector.broadcast %9 : vector<1x64xf32> to vector<8x64xf32>
    %76 = arith.addf %74, %75 : vector<8x64xf32>
    %77 = math.tanh %76 : vector<8x64xf32>
    %78 = arith.addf %49, %77 : vector<8x64xf32>
    %79 = vector.extract_strided_slice %78 {offsets = [2, 0], sizes = [1, 64], strides = [1, 1]} : vector<8x64xf32> to vector<1x64xf32>
    %80 = vector.extract_strided_slice %78 {offsets = [1, 0], sizes = [1, 64], strides = [1, 1]} : vector<8x64xf32> to vector<1x64xf32>
    %81 = vector.extract_strided_slice %78 {offsets = [6, 0], sizes = [1, 64], strides = [1, 1]} : vector<8x64xf32> to vector<1x64xf32>
    %82 = vector.extract_strided_slice %78 {offsets = [5, 0], sizes = [1, 64], strides = [1, 1]} : vector<8x64xf32> to vector<1x64xf32>
    %83 = tpu.concatenate %79, %80, %78, %81, %82 in 0 : vector<1x64xf32>, vector<1x64xf32>, vector<8x64xf32>, vector<1x64xf32>, vector<1x64xf32> -> vector<12x64xf32>
    %84 = vector.extract_strided_slice %83 {offsets = [0, 0], sizes = [10, 64], strides = [1, 1]} : vector<12x64xf32> to vector<10x64xf32>
    %85 = vector.extract_strided_slice %83 {offsets = [1, 0], sizes = [10, 64], strides = [1, 1]} : vector<12x64xf32> to vector<10x64xf32>
    %86 = vector.extract_strided_slice %83 {offsets = [2, 0], sizes = [10, 64], strides = [1, 1]} : vector<12x64xf32> to vector<10x64xf32>
    %87 = tpu.concatenate %84, %85, %86 in 1 : vector<10x64xf32>, vector<10x64xf32>, vector<10x64xf32> -> vector<10x192xf32>
    %88 = arith.truncf %87 : vector<10x192xf32> to vector<10x192xbf16>
    %cst_40 = arith.constant dense<0.000000e+00> : vector<10x64xf32>
    %89 = tpu.matmul %88, %10, %cst_40 {dimension_numbers = #tpu.dot_dimension_numbers<[1], [0], [0], [1], [0, 0, 1, 1], [], []>} : vector<10x192xbf16>, vector<192x64xbf16>, vector<10x64xf32> -> vector<10x64xf32>
    %90 = vector.broadcast %11 : vector<1x64xf32> to vector<10x64xf32>
    %91 = arith.addf %89, %90 : vector<10x64xf32>
    %cst_41 = arith.constant 0.000000e+00 : f32
    %92 = vector.broadcast %cst_41 : f32 to vector<10x64xf32>
    %93 = arith.cmpf ogt, %91, %92 : vector<10x64xf32>
    %cst_42 = arith.constant 0.00999999977 : f32
    %94 = vector.broadcast %cst_42 : f32 to vector<10x64xf32>
    %95 = arith.mulf %94, %91 : vector<10x64xf32>
    %96 = arith.select %93, %91, %95 : vector<10x64xi1>, vector<10x64xf32>
    %97 = vector.extract_strided_slice %96 {offsets = [0, 0], sizes = [8, 64], strides = [1, 1]} : vector<10x64xf32> to vector<8x64xf32>
    %98 = vector.extract_strided_slice %96 {offsets = [1, 0], sizes = [8, 64], strides = [1, 1]} : vector<10x64xf32> to vector<8x64xf32>
    %99 = vector.extract_strided_slice %96 {offsets = [2, 0], sizes = [8, 64], strides = [1, 1]} : vector<10x64xf32> to vector<8x64xf32>
    %100 = tpu.concatenate %97, %98, %99 in 1 : vector<8x64xf32>, vector<8x64xf32>, vector<8x64xf32> -> vector<8x192xf32>
    %101 = arith.truncf %100 : vector<8x192xf32> to vector<8x192xbf16>
    %cst_43 = arith.constant dense<0.000000e+00> : vector<8x64xf32>
    %102 = tpu.matmul %101, %12, %cst_43 {dimension_numbers = #tpu.dot_dimension_numbers<[1], [0], [0], [1], [0, 0, 1, 1], [], []>} : vector<8x192xbf16>, vector<192x64xbf16>, vector<8x64xf32> -> vector<8x64xf32>
    %103 = vector.broadcast %13 : vector<1x64xf32> to vector<8x64xf32>
    %104 = arith.addf %102, %103 : vector<8x64xf32>
    %105 = math.tanh %104 : vector<8x64xf32>
    %106 = arith.subf %50, %105 : vector<8x64xf32>
    %107 = math.absf %106 : vector<8x64xf32>
    %108 = vector.shape_cast %107 : vector<8x64xf32> to vector<1x8x64xf32>
    %cst_44 = arith.constant dense<0.000000e+00> : vector<1xf32>
    %109 = vector.multi_reduction <add>, %108, %cst_44 [1, 2] : vector<1x8x64xf32> to vector<1xf32>
    %110 = vector.shape_cast %109 : vector<1xf32> to vector<1x1x1xf32>
    %111 = vector.extract %110[0, 0, 0] : f32 from vector<1x1x1xf32>
    %cst_45 = arith.constant 0.000000e+00 : f32
    %112 = arith.addf %cst_45, %111 : f32
    %113 = vector.shape_cast %78 : vector<8x64xf32> to vector<1x8x64xf32>
    %cst_46 = arith.constant dense<0.000000e+00> : vector<1xf32>
    %114 = vector.multi_reduction <add>, %113, %cst_46 [1, 2] : vector<1x8x64xf32> to vector<1xf32>
    %115 = vector.shape_cast %114 : vector<1xf32> to vector<1x1x1xf32>
    %116 = vector.extract %115[0, 0, 0] : f32 from vector<1x1x1xf32>
    %cst_47 = arith.constant 0.000000e+00 : f32
    %117 = arith.addf %cst_47, %116 : f32
    %118 = vector.shape_cast %48 : vector<8x128xf32> to vector<1x8x128xf32>
    %cst_48 = arith.constant dense<0.000000e+00> : vector<1xf32>
    %119 = vector.multi_reduction <add>, %118, %cst_48 [1, 2] : vector<1x8x128xf32> to vector<1xf32>
    %120 = vector.shape_cast %119 : vector<1xf32> to vector<1x1x1xf32>
    %121 = vector.extract %120[0, 0, 0] : f32 from vector<1x1x1xf32>
    %cst_49 = arith.constant 0.000000e+00 : f32
    %122 = arith.addf %cst_49, %121 : f32
    %cst_50 = arith.constant dense<0.000000e+00> : vector<64xf32>
    %123 = vector.multi_reduction <add>, %106, %cst_50 [0] : vector<8x64xf32> to vector<64xf32>
    %124 = vector.shape_cast %123 : vector<64xf32> to vector<1x64xf32>
    %cst_51 = arith.constant 8.000000e+00 : f32
    %125 = vector.broadcast %cst_51 : f32 to vector<1x64xf32>
    %126 = arith.divf %124, %125 : vector<1x64xf32>
    %cst_52 = arith.constant dense<0.000000e+00> : vector<64xf32>
    %127 = vector.multi_reduction <add>, %78, %cst_52 [0] : vector<8x64xf32> to vector<64xf32>
    %128 = vector.shape_cast %127 : vector<64xf32> to vector<1x64xf32>
    %cst_53 = arith.constant 8.000000e+00 : f32
    %129 = vector.broadcast %cst_53 : f32 to vector<1x64xf32>
    %130 = arith.divf %128, %129 : vector<1x64xf32>
    %131 = tpu.concatenate %126, %130 in 1 : vector<1x64xf32>, vector<1x64xf32> -> vector<1x128xf32>
    %c1 = arith.constant 1 : index
    %c0_54 = arith.constant 0 : index
    %c0_55 = arith.constant 0 : index
    %132 = vector.load %arg0[%c1, %c0_54, %c0_55] : memref<2x11x4xf32, #tpu.memory_space<vmem>>, vector<1x11x4xf32>
    %133 = vector.shape_cast %132 : vector<1x11x4xf32> to vector<11x4xf32>
    %134 = vector.extract_strided_slice %133 {offsets = [0, 0], sizes = [8, 4], strides = [1, 1]} : vector<11x4xf32> to vector<8x4xf32>
    %135 = vector.extract_strided_slice %133 {offsets = [1, 0], sizes = [8, 4], strides = [1, 1]} : vector<11x4xf32> to vector<8x4xf32>
    %136 = vector.extract_strided_slice %133 {offsets = [2, 0], sizes = [8, 4], strides = [1, 1]} : vector<11x4xf32> to vector<8x4xf32>
    %137 = vector.extract_strided_slice %133 {offsets = [3, 0], sizes = [8, 4], strides = [1, 1]} : vector<11x4xf32> to vector<8x4xf32>
    %138 = tpu.concatenate %134, %135, %136, %137 in 1 : vector<8x4xf32>, vector<8x4xf32>, vector<8x4xf32>, vector<8x4xf32> -> vector<8x16xf32>
    %139 = arith.truncf %138 : vector<8x16xf32> to vector<8x16xbf16>
    %cst_56 = arith.constant dense<0.000000e+00> : vector<8x128xf32>
    %140 = tpu.matmul %139, %0, %cst_56 {dimension_numbers = #tpu.dot_dimension_numbers<[1], [0], [0], [1], [0, 0, 1, 1], [], []>} : vector<8x16xbf16>, vector<16x128xbf16>, vector<8x128xf32> -> vector<8x128xf32>
    %141 = vector.broadcast %2 : vector<1x128xf32> to vector<8x128xf32>
    %142 = arith.mulf %140, %141 : vector<8x128xf32>
    %143 = vector.broadcast %3 : vector<1x128xf32> to vector<8x128xf32>
    %144 = arith.addf %142, %143 : vector<8x128xf32>
    %cst_57 = arith.constant 0.000000e+00 : f32
    %145 = vector.broadcast %cst_57 : f32 to vector<8x128xf32>
    %146 = arith.cmpf ogt, %144, %145 : vector<8x128xf32>
    %cst_58 = arith.constant 0.00999999977 : f32
    %147 = vector.broadcast %cst_58 : f32 to vector<8x128xf32>
    %148 = arith.mulf %147, %144 : vector<8x128xf32>
    %149 = arith.select %146, %144, %148 : vector<8x128xi1>, vector<8x128xf32>
    %150 = tpu.concatenate %14, %149, %14 in 0 : vector<1x128xf32>, vector<8x128xf32>, vector<1x128xf32> -> vector<10x128xf32>
    %151 = vector.extract_strided_slice %150 {offsets = [0, 0], sizes = [8, 128], strides = [1, 1]} : vector<10x128xf32> to vector<8x128xf32>
    %152 = vector.extract_strided_slice %150 {offsets = [1, 0], sizes = [8, 128], strides = [1, 1]} : vector<10x128xf32> to vector<8x128xf32>
    %153 = vector.extract_strided_slice %150 {offsets = [2, 0], sizes = [8, 128], strides = [1, 1]} : vector<10x128xf32> to vector<8x128xf32>
    %154 = tpu.concatenate %151, %152, %153 in 1 : vector<8x128xf32>, vector<8x128xf32>, vector<8x128xf32> -> vector<8x384xf32>
    %155 = arith.truncf %154 : vector<8x384xf32> to vector<8x384xbf16>
    %cst_59 = arith.constant dense<0.000000e+00> : vector<8x128xf32>
    %156 = tpu.matmul %155, %1, %cst_59 {dimension_numbers = #tpu.dot_dimension_numbers<[1], [0], [0], [1], [0, 0, 1, 1], [], []>} : vector<8x384xbf16>, vector<384x128xbf16>, vector<8x128xf32> -> vector<8x128xf32>
    %157 = vector.broadcast %4 : vector<1x128xf32> to vector<8x128xf32>
    %158 = arith.mulf %156, %157 : vector<8x128xf32>
    %159 = vector.broadcast %5 : vector<1x128xf32> to vector<8x128xf32>
    %160 = arith.addf %158, %159 : vector<8x128xf32>
    %cst_60 = arith.constant 0.000000e+00 : f32
    %161 = vector.broadcast %cst_60 : f32 to vector<8x128xf32>
    %162 = arith.cmpf ogt, %160, %161 : vector<8x128xf32>
    %cst_61 = arith.constant 0.00999999977 : f32
    %163 = vector.broadcast %cst_61 : f32 to vector<8x128xf32>
    %164 = arith.mulf %163, %160 : vector<8x128xf32>
    %165 = arith.select %162, %160, %164 : vector<8x128xi1>, vector<8x128xf32>
    %166 = vector.extract_strided_slice %165 {offsets = [0, 0], sizes = [8, 64], strides = [1, 1]} : vector<8x128xf32> to vector<8x64xf32>
    %167 = vector.extract_strided_slice %165 {offsets = [0, 64], sizes = [8, 64], strides = [1, 1]} : vector<8x128xf32> to vector<8x64xf32>
    %168 = vector.extract_strided_slice %167 {offsets = [2, 0], sizes = [1, 64], strides = [1, 1]} : vector<8x64xf32> to vector<1x64xf32>
    %169 = vector.extract_strided_slice %167 {offsets = [1, 0], sizes = [1, 64], strides = [1, 1]} : vector<8x64xf32> to vector<1x64xf32>
    %170 = vector.extract_strided_slice %167 {offsets = [6, 0], sizes = [1, 64], strides = [1, 1]} : vector<8x64xf32> to vector<1x64xf32>
    %171 = vector.extract_strided_slice %167 {offsets = [5, 0], sizes = [1, 64], strides = [1, 1]} : vector<8x64xf32> to vector<1x64xf32>
    %172 = tpu.concatenate %168, %169, %167, %170, %171 in 0 : vector<1x64xf32>, vector<1x64xf32>, vector<8x64xf32>, vector<1x64xf32>, vector<1x64xf32> -> vector<12x64xf32>
    %173 = vector.extract_strided_slice %172 {offsets = [0, 0], sizes = [10, 64], strides = [1, 1]} : vector<12x64xf32> to vector<10x64xf32>
    %174 = vector.extract_strided_slice %172 {offsets = [1, 0], sizes = [10, 64], strides = [1, 1]} : vector<12x64xf32> to vector<10x64xf32>
    %175 = vector.extract_strided_slice %172 {offsets = [2, 0], sizes = [10, 64], strides = [1, 1]} : vector<12x64xf32> to vector<10x64xf32>
    %176 = tpu.concatenate %173, %174, %175 in 1 : vector<10x64xf32>, vector<10x64xf32>, vector<10x64xf32> -> vector<10x192xf32>
    %177 = arith.truncf %176 : vector<10x192xf32> to vector<10x192xbf16>
    %cst_62 = arith.constant dense<0.000000e+00> : vector<10x64xf32>
    %178 = tpu.matmul %177, %6, %cst_62 {dimension_numbers = #tpu.dot_dimension_numbers<[1], [0], [0], [1], [0, 0, 1, 1], [], []>} : vector<10x192xbf16>, vector<192x64xbf16>, vector<10x64xf32> -> vector<10x64xf32>
    %179 = vector.broadcast %7 : vector<1x64xf32> to vector<10x64xf32>
    %180 = arith.addf %178, %179 : vector<10x64xf32>
    %cst_63 = arith.constant 0.000000e+00 : f32
    %181 = vector.broadcast %cst_63 : f32 to vector<10x64xf32>
    %182 = arith.cmpf ogt, %180, %181 : vector<10x64xf32>
    %cst_64 = arith.constant 0.00999999977 : f32
    %183 = vector.broadcast %cst_64 : f32 to vector<10x64xf32>
    %184 = arith.mulf %183, %180 : vector<10x64xf32>
    %185 = arith.select %182, %180, %184 : vector<10x64xi1>, vector<10x64xf32>
    %186 = vector.extract_strided_slice %185 {offsets = [0, 0], sizes = [8, 64], strides = [1, 1]} : vector<10x64xf32> to vector<8x64xf32>
    %187 = vector.extract_strided_slice %185 {offsets = [1, 0], sizes = [8, 64], strides = [1, 1]} : vector<10x64xf32> to vector<8x64xf32>
    %188 = vector.extract_strided_slice %185 {offsets = [2, 0], sizes = [8, 64], strides = [1, 1]} : vector<10x64xf32> to vector<8x64xf32>
    %189 = tpu.concatenate %186, %187, %188 in 1 : vector<8x64xf32>, vector<8x64xf32>, vector<8x64xf32> -> vector<8x192xf32>
    %190 = arith.truncf %189 : vector<8x192xf32> to vector<8x192xbf16>
    %cst_65 = arith.constant dense<0.000000e+00> : vector<8x64xf32>
    %191 = tpu.matmul %190, %8, %cst_65 {dimension_numbers = #tpu.dot_dimension_numbers<[1], [0], [0], [1], [0, 0, 1, 1], [], []>} : vector<8x192xbf16>, vector<192x64xbf16>, vector<8x64xf32> -> vector<8x64xf32>
    %192 = vector.broadcast %9 : vector<1x64xf32> to vector<8x64xf32>
    %193 = arith.addf %191, %192 : vector<8x64xf32>
    %194 = math.tanh %193 : vector<8x64xf32>
    %195 = arith.addf %166, %194 : vector<8x64xf32>
    %196 = vector.extract_strided_slice %195 {offsets = [2, 0], sizes = [1, 64], strides = [1, 1]} : vector<8x64xf32> to vector<1x64xf32>
    %197 = vector.extract_strided_slice %195 {offsets = [1, 0], sizes = [1, 64], strides = [1, 1]} : vector<8x64xf32> to vector<1x64xf32>
    %198 = vector.extract_strided_slice %195 {offsets = [6, 0], sizes = [1, 64], strides = [1, 1]} : vector<8x64xf32> to vector<1x64xf32>
    %199 = vector.extract_strided_slice %195 {offsets = [5, 0], sizes = [1, 64], strides = [1, 1]} : vector<8x64xf32> to vector<1x64xf32>
    %200 = tpu.concatenate %196, %197, %195, %198, %199 in 0 : vector<1x64xf32>, vector<1x64xf32>, vector<8x64xf32>, vector<1x64xf32>, vector<1x64xf32> -> vector<12x64xf32>
    %201 = vector.extract_strided_slice %200 {offsets = [0, 0], sizes = [10, 64], strides = [1, 1]} : vector<12x64xf32> to vector<10x64xf32>
    %202 = vector.extract_strided_slice %200 {offsets = [1, 0], sizes = [10, 64], strides = [1, 1]} : vector<12x64xf32> to vector<10x64xf32>
    %203 = vector.extract_strided_slice %200 {offsets = [2, 0], sizes = [10, 64], strides = [1, 1]} : vector<12x64xf32> to vector<10x64xf32>
    %204 = tpu.concatenate %201, %202, %203 in 1 : vector<10x64xf32>, vector<10x64xf32>, vector<10x64xf32> -> vector<10x192xf32>
    %205 = arith.truncf %204 : vector<10x192xf32> to vector<10x192xbf16>
    %cst_66 = arith.constant dense<0.000000e+00> : vector<10x64xf32>
    %206 = tpu.matmul %205, %10, %cst_66 {dimension_numbers = #tpu.dot_dimension_numbers<[1], [0], [0], [1], [0, 0, 1, 1], [], []>} : vector<10x192xbf16>, vector<192x64xbf16>, vector<10x64xf32> -> vector<10x64xf32>
    %207 = vector.broadcast %11 : vector<1x64xf32> to vector<10x64xf32>
    %208 = arith.addf %206, %207 : vector<10x64xf32>
    %cst_67 = arith.constant 0.000000e+00 : f32
    %209 = vector.broadcast %cst_67 : f32 to vector<10x64xf32>
    %210 = arith.cmpf ogt, %208, %209 : vector<10x64xf32>
    %cst_68 = arith.constant 0.00999999977 : f32
    %211 = vector.broadcast %cst_68 : f32 to vector<10x64xf32>
    %212 = arith.mulf %211, %208 : vector<10x64xf32>
    %213 = arith.select %210, %208, %212 : vector<10x64xi1>, vector<10x64xf32>
    %214 = vector.extract_strided_slice %213 {offsets = [0, 0], sizes = [8, 64], strides = [1, 1]} : vector<10x64xf32> to vector<8x64xf32>
    %215 = vector.extract_strided_slice %213 {offsets = [1, 0], sizes = [8, 64], strides = [1, 1]} : vector<10x64xf32> to vector<8x64xf32>
    %216 = vector.extract_strided_slice %213 {offsets = [2, 0], sizes = [8, 64], strides = [1, 1]} : vector<10x64xf32> to vector<8x64xf32>
    %217 = tpu.concatenate %214, %215, %216 in 1 : vector<8x64xf32>, vector<8x64xf32>, vector<8x64xf32> -> vector<8x192xf32>
    %218 = arith.truncf %217 : vector<8x192xf32> to vector<8x192xbf16>
    %cst_69 = arith.constant dense<0.000000e+00> : vector<8x64xf32>
    %219 = tpu.matmul %218, %12, %cst_69 {dimension_numbers = #tpu.dot_dimension_numbers<[1], [0], [0], [1], [0, 0, 1, 1], [], []>} : vector<8x192xbf16>, vector<192x64xbf16>, vector<8x64xf32> -> vector<8x64xf32>
    %220 = vector.broadcast %13 : vector<1x64xf32> to vector<8x64xf32>
    %221 = arith.addf %219, %220 : vector<8x64xf32>
    %222 = math.tanh %221 : vector<8x64xf32>
    %223 = arith.subf %167, %222 : vector<8x64xf32>
    %224 = math.absf %223 : vector<8x64xf32>
    %225 = vector.shape_cast %224 : vector<8x64xf32> to vector<1x8x64xf32>
    %cst_70 = arith.constant dense<0.000000e+00> : vector<1xf32>
    %226 = vector.multi_reduction <add>, %225, %cst_70 [1, 2] : vector<1x8x64xf32> to vector<1xf32>
    %227 = vector.shape_cast %226 : vector<1xf32> to vector<1x1x1xf32>
    %228 = vector.extract %227[0, 0, 0] : f32 from vector<1x1x1xf32>
    %229 = arith.addf %112, %228 : f32
    %230 = vector.shape_cast %195 : vector<8x64xf32> to vector<1x8x64xf32>
    %cst_71 = arith.constant dense<0.000000e+00> : vector<1xf32>
    %231 = vector.multi_reduction <add>, %230, %cst_71 [1, 2] : vector<1x8x64xf32> to vector<1xf32>
    %232 = vector.shape_cast %231 : vector<1xf32> to vector<1x1x1xf32>
    %233 = vector.extract %232[0, 0, 0] : f32 from vector<1x1x1xf32>
    %234 = arith.addf %117, %233 : f32
    %235 = vector.shape_cast %165 : vector<8x128xf32> to vector<1x8x128xf32>
    %cst_72 = arith.constant dense<0.000000e+00> : vector<1xf32>
    %236 = vector.multi_reduction <add>, %235, %cst_72 [1, 2] : vector<1x8x128xf32> to vector<1xf32>
    %237 = vector.shape_cast %236 : vector<1xf32> to vector<1x1x1xf32>
    %238 = vector.extract %237[0, 0, 0] : f32 from vector<1x1x1xf32>
    %239 = arith.addf %122, %238 : f32
    %cst_73 = arith.constant dense<0.000000e+00> : vector<64xf32>
    %240 = vector.multi_reduction <add>, %223, %cst_73 [0] : vector<8x64xf32> to vector<64xf32>
    %241 = vector.shape_cast %240 : vector<64xf32> to vector<1x64xf32>
    %cst_74 = arith.constant 8.000000e+00 : f32
    %242 = vector.broadcast %cst_74 : f32 to vector<1x64xf32>
    %243 = arith.divf %241, %242 : vector<1x64xf32>
    %cst_75 = arith.constant dense<0.000000e+00> : vector<64xf32>
    %244 = vector.multi_reduction <add>, %195, %cst_75 [0] : vector<8x64xf32> to vector<64xf32>
    %245 = vector.shape_cast %244 : vector<64xf32> to vector<1x64xf32>
    %cst_76 = arith.constant 8.000000e+00 : f32
    %246 = vector.broadcast %cst_76 : f32 to vector<1x64xf32>
    %247 = arith.divf %245, %246 : vector<1x64xf32>
    %248 = tpu.concatenate %243, %247 in 1 : vector<1x64xf32>, vector<1x64xf32> -> vector<1x128xf32>
    %cst_77 = arith.constant 1.024000e+03 : f32
    %249 = arith.divf %229, %cst_77 : f32
    %cst_78 = arith.constant 0.00999999977 : f32
    %250 = arith.mulf %cst_78, %249 : f32
    %cst_79 = arith.constant 1.024000e+03 : f32
    %251 = arith.divf %234, %cst_79 : f32
    %cst_80 = arith.constant 2.048000e+03 : f32
    %252 = arith.divf %239, %cst_80 : f32
    %253 = arith.subf %251, %252 : f32
    %254 = math.absf %253 : f32
    %cst_81 = arith.constant 0.00999999977 : f32
    %255 = arith.mulf %cst_81, %254 : f32
    %256 = arith.addf %250, %255 : f32
    %c0_82 = arith.constant 0 : index
    %c0_83 = arith.constant 0 : index
    %257 = memref.load %arg22[%c0_82, %c0_83] : memref<1x1xf32, #tpu.memory_space<smem>>
    memref.store %256, %arg22[%c0_82, %c0_83] : memref<1x1xf32, #tpu.memory_space<smem>>
    %258 = tpu.concatenate %131, %248 in 0 : vector<1x128xf32>, vector<1x128xf32> -> vector<2x128xf32>
    %c0_84 = arith.constant 0 : index
    %c0_85 = arith.constant 0 : index
    %259 = vector.load %arg15[%c0_84, %c0_85] : memref<128x32xbf16, #tpu.memory_space<vmem>>, vector<128x32xbf16>
    %260 = arith.truncf %258 : vector<2x128xf32> to vector<2x128xbf16>
    %cst_86 = arith.constant dense<0.000000e+00> : vector<2x32xf32>
    %261 = tpu.matmul %260, %259, %cst_86 {dimension_numbers = #tpu.dot_dimension_numbers<[1], [0], [0], [1], [0, 0, 1, 1], [], []>} : vector<2x128xbf16>, vector<128x32xbf16>, vector<2x32xf32> -> vector<2x32xf32>
    %cst_87 = arith.constant 0.000000e+00 : f32
    %262 = vector.broadcast %cst_87 : f32 to vector<2x32xf32>
    %263 = arith.maximumf %261, %262 : vector<2x32xf32>
    %c0_88 = arith.constant 0 : index
    %c0_89 = arith.constant 0 : index
    %264 = vector.load %arg16[%c0_88, %c0_89] : memref<32x128xbf16, #tpu.memory_space<vmem>>, vector<32x128xbf16>
    %265 = arith.truncf %263 : vector<2x32xf32> to vector<2x32xbf16>
    %cst_90 = arith.constant dense<0.000000e+00> : vector<2x128xf32>
    %266 = tpu.matmul %265, %264, %cst_90 {dimension_numbers = #tpu.dot_dimension_numbers<[1], [0], [0], [1], [0, 0, 1, 1], [], []>} : vector<2x32xbf16>, vector<32x128xbf16>, vector<2x128xf32> -> vector<2x128xf32>
    %cst_91 = arith.constant 0.000000e+00 : f32
    %267 = vector.broadcast %cst_91 : f32 to vector<2x128xf32>
    %268 = arith.subf %267, %266 : vector<2x128xf32>
    %269 = math.exp %268 : vector<2x128xf32>
    %cst_92 = arith.constant 1.000000e+00 : f32
    %270 = vector.broadcast %cst_92 : f32 to vector<2x128xf32>
    %271 = arith.addf %270, %269 : vector<2x128xf32>
    %272 = tpu.reciprocal %271 {approx = true} : vector<2x128xf32> -> vector<2x128xf32>
    %273 = arith.mulf %272, %258 : vector<2x128xf32>
    %c0_93 = arith.constant 0 : index
    %c0_94 = arith.constant 0 : index
    %274 = vector.load %arg17[%c0_93, %c0_94] : memref<128x256xbf16, #tpu.memory_space<vmem>>, vector<128x256xbf16>
    %275 = arith.truncf %273 : vector<2x128xf32> to vector<2x128xbf16>
    %cst_95 = arith.constant dense<0.000000e+00> : vector<2x256xf32>
    %276 = tpu.matmul %275, %274, %cst_95 {dimension_numbers = #tpu.dot_dimension_numbers<[1], [0], [0], [1], [0, 0, 1, 1], [], []>} : vector<2x128xbf16>, vector<128x256xbf16>, vector<2x256xf32> -> vector<2x256xf32>
    %c0_96 = arith.constant 0 : index
    %c0_97 = arith.constant 0 : index
    %277 = vector.load %arg18[%c0_96, %c0_97] : memref<1x256xf32, #tpu.memory_space<vmem>>, vector<1x256xf32>
    %278 = vector.broadcast %277 : vector<1x256xf32> to vector<2x256xf32>
    %279 = arith.addf %276, %278 : vector<2x256xf32>
    %cst_98 = arith.constant 0.000000e+00 : f32
    %280 = vector.broadcast %cst_98 : f32 to vector<2x256xf32>
    %281 = arith.cmpf ogt, %279, %280 : vector<2x256xf32>
    %cst_99 = arith.constant 0.00999999977 : f32
    %282 = vector.broadcast %cst_99 : f32 to vector<2x256xf32>
    %283 = arith.mulf %282, %279 : vector<2x256xf32>
    %284 = arith.select %281, %279, %283 : vector<2x256xi1>, vector<2x256xf32>
    %c0_100 = arith.constant 0 : index
    %c0_101 = arith.constant 0 : index
    %285 = vector.load %arg19[%c0_100, %c0_101] : memref<256x10xbf16, #tpu.memory_space<vmem>>, vector<256x10xbf16>
    %286 = arith.truncf %284 : vector<2x256xf32> to vector<2x256xbf16>
    %cst_102 = arith.constant dense<0.000000e+00> : vector<2x10xf32>
    %287 = tpu.matmul %286, %285, %cst_102 {dimension_numbers = #tpu.dot_dimension_numbers<[1], [0], [0], [1], [0, 0, 1, 1], [], []>} : vector<2x256xbf16>, vector<256x10xbf16>, vector<2x10xf32> -> vector<2x10xf32>
    %c0_103 = arith.constant 0 : index
    %c0_104 = arith.constant 0 : index
    %288 = vector.load %arg20[%c0_103, %c0_104] : memref<1x10xf32, #tpu.memory_space<vmem>>, vector<1x10xf32>
    %289 = vector.broadcast %288 : vector<1x10xf32> to vector<2x10xf32>
    %290 = arith.addf %287, %289 : vector<2x10xf32>
    %c0_105 = arith.constant 0 : index
    %c0_106 = arith.constant 0 : index
    %291 = vector.load %arg21[%c0_105, %c0_106] : memref<2x10xf32, #tpu.memory_space<vmem>>, vector<2x10xf32>
    tpu.vector_store %arg21[%c0_105, %c0_106], %290 {strides = array<i32>} : memref<2x10xf32, #tpu.memory_space<vmem>>, vector<2x10xf32>,
    return
  }
}

</mosaic_0001>

<bundles_post_ra>
// kernel: awn_forward.1
= control target key start
LH: loop header
LB: loop body
LE: loop exit
PB: predicated region body
PF: predicated region fallthrough
CT: control target
= control target key end

     0   :  { %s4055_s0 = inlined_call_operand.vmem [shape: f32[2,11,4], index: 0, kind: input, shape index: {}]   ;;  %s4056_s1 = inlined_call_operand.vmem [shape: bf16[16,128], index: 1, kind: input, shape index: {}]   ;;  %s4057_s2 = inlined_call_operand.vmem [shape: f32[1,128], index: 2, kind: input, shape index: {}]   ;;  %s4058_s3 = inlined_call_operand.vmem [shape: f32[1,128], index: 3, kind: input, shape index: {}]   ;;  %s4059_s4 = inlined_call_operand.vmem [shape: bf16[384,128], index: 4, kind: input, shape index: {}]   ;;  %s4060_s5 = inlined_call_operand.vmem [shape: f32[1,128], index: 5, kind: input, shape index: {}]   ;;  %s4061_s6 = inlined_call_operand.vmem [shape: f32[1,128], index: 6, kind: input, shape index: {}]   ;;  %s4062_s7 = inlined_call_operand.vmem [shape: bf16[192,64], index: 7, kind: input, shape index: {}]   ;;  %s4063_s8 = inlined_call_operand.vmem [shape: f32[1,64], index: 8, kind: input, shape index: {}]   ;;  %s4064_s9 = inlined_call_operand.vmem [shape: bf16[192,64], index: 9, kind: input, shape index: {}]   ;;  %s4065_s10 = inlined_call_operand.vmem [shape: f32[1,64], index: 10, kind: input, shape index: {}]   ;;  %s4066_s11 = inlined_call_operand.vmem [shape: bf16[192,64], index: 11, kind: input, shape index: {}]   ;;  %s4067_s12 = inlined_call_operand.vmem [shape: f32[1,64], index: 12, kind: input, shape index: {}]   ;;  %s4068_s13 = inlined_call_operand.vmem [shape: bf16[192,64], index: 13, kind: input, shape index: {}]   ;;  %s4069_s14 = inlined_call_operand.vmem [shape: f32[1,64], index: 14, kind: input, shape index: {}]   ;;  %s4070_s15 = inlined_call_operand.vmem [shape: bf16[128,32], index: 15, kind: input, shape index: {}]   ;;  %s4071_s16 = inlined_call_operand.vmem [shape: bf16[32,128], index: 16, kind: input, shape index: {}]   ;;  %s4072_s17 = inlined_call_operand.vmem [shape: bf16[128,256], index: 17, kind: input, shape index: {}]   ;;  %s4073_s18 = inlined_call_operand.vmem [shape: f32[1,256], index: 18, kind: input, shape index: {}]   ;;  %s4074_s19 = inlined_call_operand.vmem [shape: bf16[256,10], index: 19, kind: input, shape index: {}]   ;;  %s4075_s20 = inlined_call_operand.vmem [shape: f32[1,10], index: 20, kind: input, shape index: {}]   ;;  %s4076_s21 = inlined_call_operand.hbm [shape: f32[2,10], index: 21, kind: output, shape index: {0}]   ;;  %s4077_s22 = inlined_call_operand.hbm [shape: f32[1,1], index: 22, kind: output, shape index: {1}]  }
   0x1   :  { %4116 = sst [smem:[#allocation37_spill]] %s4055_s0 }
   0x2   :  { %4117 = sst [smem:[#allocation38_spill]] %s4056_s1 }
   0x3   :  { %4118 = sst [smem:[#allocation39_spill]] %s4057_s2 }
   0x4   :  { %4119 = sst [smem:[#allocation40_spill]] %s4058_s3 }
   0x5   :  { %4120 = sst [smem:[#allocation41_spill]] %s4059_s4 }
   0x6   :  { %4121 = sst [smem:[#allocation42_spill]] %s4060_s5 }
   0x7   :  { %4122 = sst [smem:[#allocation43_spill]] %s4061_s6 }
   0x8   :  { %28 = vsyncpa [#allocation3], 0  ;;  %s4123_s29 = sld [smem:[#allocation37_spill]]  ;;  %vm231_vm0 = vcmask 1046528   ;;  %vm238_vm1 = vcmask 1045504   ;;  %vm245_vm2 = vcmask 1044480  }
   0x9   :  { %s4124_s1 = sld [smem:[#allocation38_spill]]  ;;  %s4125_s6 = sld [smem:[#allocation41_spill]]  ;;  %v4081_v12 = vmov 0.0   ;;  %vm2900_vm3 = vmmov 0  }
   0xa   :  { %s2897_s25 = smov 4   ;;  %2589 = vmatprep.subr.bf16.mxu1 %v4081_v12  ;;  %s2899_s27 = smov 12   ;;  %2591 = vmatprep.mubr.msk.bf16.mxu1 %vm2900_vm3, %v4081_v12 }
   0xb   :  { %2595 = vmatprep.subr.bf16.mxu0 %v4081_v12  ;;  %s2901_s3 = smov 8   ;;  %2611 = vmatprep.mubr.msk.bf16.mxu0 %vm2900_vm3, %v4081_v12 }
   0xe   :  { %v227_v0 = vld [vmem:[%s4123_s29] sm:$0xff]  ;;  %v228_v1 = vld [vmem:[%s4123_s29 + $0x8] sm:$0x7] }
   0xf   :  { %v232_v2 = vrot.slane %v227_v0, 1  ;;  %v233_v3 = vrot.slane %v228_v1, 1  ;;  %v239_v4 = vrot.slane %v227_v0, 2  ;;  %v240_v5 = vrot.slane %v228_v1, 2  ;;  %v2720_v9 = vld [vmem:[%s4124_s1] sm:$0xff]   ;;  %v2725_v15 = vld [vmem:[%s4125_s6 + $0x88] sm:$0xff]  }
  0x10   :  { %v246_v6 = vrot.slane %v227_v0, 3  ;;  %v247_v7 = vrot.slane %v228_v1, 3  ;;  %v2721_v10 = vld [vmem:[%s4125_s6 + $0x40] sm:$0xff]   ;;  %2590 = vmatpush3.bf16.msra.mxu1 %v2720_v9  ;;  %v2728_v16 = vld [vmem:[%s4125_s6 + $0x90] sm:$0xff]   ;;  %v2731_v17 = vld [vmem:[%s4125_s6 + $0x98] sm:$0xff]  }
  0x11   :  { %v234_v8 = vsel %vm231_vm0, %v232_v2, %v233_v3  ;;  %v2722_v13 = vld [vmem:[%s4125_s6 + $0x80] sm:$0xff]   ;;  %v241_v14 = vsel %vm238_vm1, %v239_v4, %v240_v5  ;;  %2491 = vmatprep.subr.bf16.mxu1 %v2721_v10 }
  0x12   :  { %235 = vrot.lane.b32.xlu0 %v234_v8, %s2897_s25  ;;  %v248_v11 = vsel %vm245_vm2, %v246_v6, %v247_v7  ;;  %2596 = vmatpush3.bf16.msra.mxu0 %v2722_v13 }
  0x13   :  { %249 = vrot.lane.b32.xlu1 %v248_v11, %s2899_s27  ;;  %2597 = vmatprep.subr.bf16.mxu0 %v4081_v12 }
  0x16   :  { %242 = vrot.lane.b32.xlu0 %v241_v14, %s2901_s3  ;;  %2598 = vmatpush3.bf16.msra.mxu0 %v2725_v15 }
  0x17   :  { %2599 = vmatprep.subr.bf16.mxu0 %v4081_v12 }
  0x1a   :  { %2600 = vmatpush3.bf16.msra.mxu0 %v2728_v16 }
  0x1b   :  { %2601 = vmatprep.subr.bf16.mxu0 %v4081_v12 }
  0x1e   :  { %2602 = vmatpush3.bf16.msra.mxu0 %v2731_v17 }
  0x1f   :  { %2603 = vmatprep.subr.bf16.mxu0 %v4081_v12 }
  0x20   :  { %29 = vsyncpa [#allocation4], 0  ;;  %vm252_vm4 = vcmask 31744   ;;  %vm254_vm5 = vcmask 64512   ;;  %vm256_vm6 = vcmask 97280   ;;  %vm265_vm7 = vcmask 130048  }
  0x21   :  { %v3067_v24 = vld [vmem:[%s4125_s6] sm:$0xff]   ;;  %v3072_v26 = vld [vmem:[%s4125_s6 + $0x48] sm:$0xff]   ;;  %v3085_v28 = vld [vmem:[%s4125_s6 + $0x50] sm:$0xff]   ;;  %s4126_s30 = sld [smem:[#allocation39_spill]]  ;;  %s4127_s23 = sld [smem:[#allocation40_spill]]  ;;  %vm329_vm9 = vcmask 1040384  }
  0x22   :  { %v3079_v27 = vld [vmem:[%s4125_s6 + $0x8] sm:$0xff]   ;;  %v3091_v29 = vld [vmem:[%s4125_s6 + $0x10] sm:$0xff]   ;;  %v3097_v30 = vld [vmem:[%s4125_s6 + $0x58] sm:$0xff]   ;;  %v4084_v4 = vmov 0   ;;  %s4134_s28 = sld [smem:[#allocation42_spill]]  ;;  %s4136_s0 = sld [smem:[#allocation43_spill]] }
  0x23   :  { %v3103_v31 = vld [vmem:[%s4125_s6 + $0x18] sm:$0xff]   ;;  %v3110_v32 = vld [vmem:[%s4125_s6 + $0x60] sm:$0xff]   ;;  %v3129_v35 = vld [vmem:[%s4125_s6 + $0x68] sm:$0xff]   ;;  %vm594_vm13 = vcmask 1041408   ;;  %vm597_vm14 = vcmask 1042432   ;;  %vm621_vm15 = vcmask 523264  }
  0x24   :  { %v3115_v33 = vld [vmem:[%s4125_s6 + $0xa0] sm:$0xff]   ;;  %v3134_v36 = vld [vmem:[%s4125_s6 + $0xa8] sm:$0xff]   ;;  %v3148_v38 = vld [vmem:[%s4125_s6 + $0x70] sm:$0xff]  }
  0x25   :  { %v3120_v34 = vld [vmem:[%s4125_s6 + $0x20] sm:$0xff]   ;;  %2604 = vmatpush3.bf16.msra.mxu0 %v3115_v33  ;;  %v3139_v37 = vld [vmem:[%s4125_s6 + $0x28] sm:$0xff]   ;;  %v3153_v39 = vld [vmem:[%s4125_s6 + $0xb0] sm:$0xff]  }
  0x26   :  { %2605 = vmatprep.subr.bf16.mxu0 %v4081_v12  ;;  %v3158_v40 = vld [vmem:[%s4125_s6 + $0x30] sm:$0xff]   ;;  %v3167_v41 = vld [vmem:[%s4125_s6 + $0x78] sm:$0xff]   ;;  %vm3197_vm10 = vmneg %vm329_vm9 }
  0x27   :  { %v3172_v42 = vld [vmem:[%s4125_s6 + $0xb8] sm:$0xff]   ;;  %v3185_v44 = vld [vmem:[%s4126_s30] ss:$0 sm:$0xff]  ;;  %vm2372_vm11 = vmpackc.low %vm3197_vm10, %vm3197_vm10 }
  0x28   :  { %v3177_v43 = vld [vmem:[%s4125_s6 + $0x38] sm:$0xff]   ;;  %v3190_v45 = vld [vmem:[%s4127_s23] ss:$0 sm:$0xff]  ;;  %v3222_v5 = vld [vmem:[%s4062_s7 + $0x8] sm:$0xff]  }
  0x29   :  { %2606 = vmatpush3.bf16.msra.mxu0 %v3134_v36  ;;  %v3214_v3 = vld [vmem:[%s4062_s7] sm:$0xff]   ;;  %v3229_v6 = vld [vmem:[%s4062_s7 + $0x10] sm:$0xff]   ;;  %v3236_v7 = vld [vmem:[%s4062_s7 + $0x18] sm:$0xff]  }
  0x2a   :  { %2607 = vmatprep.subr.bf16.mxu0 %v4081_v12  ;;  %v3243_v8 = vld [vmem:[%s4062_s7 + $0x20] sm:$0xff]   ;;  %v3250_v9 = vld [vmem:[%s4062_s7 + $0x28] sm:$0xff]   ;;  %v3257_v10 = vld [vmem:[%s4062_s7 + $0x30] sm:$0xff]  }
  0x2b   :  { %4130 = vst [vmem:[#allocation8_spill] sm:$0xff] %v3257_v10  ;;  %v3264_v11 = vld [vmem:[%s4062_s7 + $0x38] sm:$0xff]   ;;  %v3271_v13 = vld [vmem:[%s4062_s7 + $0x40] sm:$0xff]   ;;  %v3278_v14 = vld [vmem:[%s4062_s7 + $0x48] sm:$0xff]  }
  0x2c   :  { %4131 = vst [vmem:[#allocation9_spill] sm:$0xff] %v3264_v11  ;;  %4132 = vst [vmem:[#allocation10_spill] sm:$0xff] %v3271_v13 }
  0x2d   :  { %2608 = vmatpush3.bf16.msra.mxu0 %v3153_v39  ;;  %4133 = vst [vmem:[#allocation11_spill] sm:$0xff] %v3278_v14 }
  0x2e   :  { %2609 = vmatprep.subr.bf16.mxu0 %v4081_v12 }
  0x31   :  { %2610 = vmatpush3.bf16.msra.mxu0 %v3172_v42 }
  0x32   :  { %850 = vmatprep.subr.bf16.mxu0 %v4084_v4 }
  0x84   :  { %v236_v18 = vpop.permute.xlu0 %235 }
  0x85   :  { %v250_v19 = vpop.permute.xlu1 %249  ;;  %v253_v20 = vsel %vm252_vm4, %v227_v0, %v236_v18 }
  0x88   :  { %v243_v21 = vpop.permute.xlu0 %242 }
  0x89   :  { %v255_v22 = vsel %vm254_vm5, %v253_v20, %v243_v21 }
  0x8a   :  { %v257_v23 = vsel %vm256_vm6, %v255_v22, %v250_v19 }
  0x8b   :  { %v258_v25 = vpack.c.bf16 %v257_v23, %v257_v23  ;;  %v3286_v23 = vld [vmem:[%s4134_s28] ss:$0 sm:$0xff] }
  0x8c   :  { %4135 = vst [vmem:[#allocation12_spill] sm:$0xff] %v3286_v23 }
  0x8d   :  { %2592 = vmatmul.mubr.msk.bf16.vlgmr.msra.gmra.mrb[0].mxu1 %vm265_vm7, %v258_v25 }
  0x8e   :  { %2492 = vmatpush3.bf16.msra.mxu1 %v3067_v24 }
  0x8f   :  { %2493 = vmatprep.subr.bf16.mxu1 %v3072_v26 }
  0x92   :  { %2494 = vmatpush3.bf16.msra.mxu1 %v3079_v27 }
  0x93   :  { %2495 = vmatprep.subr.bf16.mxu1 %v3085_v28 }
  0x96   :  { %2496 = vmatpush3.bf16.msra.mxu1 %v3091_v29 }
  0x97   :  { %2497 = vmatprep.subr.bf16.mxu1 %v3097_v30 }
  0x9a   :  { %2498 = vmatpush3.bf16.msra.mxu1 %v3103_v31 }
  0x9b   :  { %2499 = vmatprep.subr.bf16.mxu1 %v3110_v32 }
  0x9e   :  { %2500 = vmatpush3.bf16.msra.mxu1 %v3120_v34 }
  0x9f   :  { %2501 = vmatprep.subr.bf16.mxu1 %v3129_v35 }
  0xa2   :  { %2502 = vmatpush3.bf16.msra.mxu1 %v3139_v37 }
  0xa3   :  { %2503 = vmatprep.subr.bf16.mxu1 %v3148_v38 }
  0xa6   :  { %2504 = vmatpush3.bf16.msra.mxu1 %v3158_v40 }
  0xa7   :  { %2505 = vmatprep.subr.bf16.mxu1 %v3167_v41 }
  0xaa   :  { %2506 = vmatpush3.bf16.msra.mxu1 %v3177_v43 }
  0xab   :  { %707 = vmatprep.subr.bf16.mxu1 %v4084_v4 }
 0x160   :  { %v303_v46 = vpop.f32.mrb[0].mxu1 }
 0x161   :  { %v315_v47 = vmul.f32 %v3185_v44, %v303_v46  ;;  %v2593_v48 = vpop.f32.mrb[1].mxu1 }
 0x162   :  { %v306_v49 = vpop.f32.mrb[2].mxu1 }
 0x163   :  { %v322_v50 = vadd.f32 %v3190_v45, %v315_v47  ;;  %v2594_v51 = vpop.f32.mrb[3].mxu1  ;;  %v3291_v47 = vld [vmem:[%s4136_s0] ss:$0 sm:$0xff]  ;;  %v3297_v49 = vld [vmem:[%s4062_s7 + $0x50] sm:$0xff]  }
 0x164   :  { %4137 = vst [vmem:[#allocation13_spill] sm:$0xff] %v3291_v47  ;;  %4138 = vst [vmem:[#allocation14_spill] sm:$0xff] %v3297_v49 }
 0x165   :  { %vm323_vm8 = vcmp.gt.f32.partialorder %v322_v50, 0.0  ;;  %v324_v52 = vmul.f32 0.01, %v322_v50 }
 0x167   :  { %v325_v53 = vsel %vm323_vm8, %v322_v50, %v324_v52  ;;  %v3305_v52 = vld [vmem:[%s4062_s7 + $0x58] sm:$0xff]   ;;  %s2903_s7 = smov 64  }
 0x168   :  { %v327_v54 = vrot.slane %v325_v53, 7  ;;  %4139 = vst [vmem:[#allocation15_spill] sm:$0xff] %v3305_v52 }
 0x16a   :  { %v330_v55 = vsel %vm329_vm9, 0.0, %v327_v54  ;;  %v331_v56 = vsel %vm329_vm9, %v327_v54, 0.0  ;;  %v2373_v2 = vpack.c.bf16 %v327_v54, %v327_v54 }
 0x16b   :  { %v334_v57 = vrot.slane %v330_v55, 1  ;;  %v335_v58 = vrot.slane %v331_v56, 1  ;;  %v338_v59 = vrot.slane %v330_v55, 2  ;;  %v339_v60 = vrot.slane %v331_v56, 2 }
 0x16d   :  { %v336_v62 = vsel %vm231_vm0, %v334_v57, %v335_v58  ;;  %v340_v63 = vsel %vm238_vm1, %v338_v59, %v339_v60 }
 0x16e   :  { %v343_v0 = vpack.c.bf16 %v336_v62, %v336_v62  ;;  %v344_v1 = vpack.c.bf16 %v340_v63, %v340_v63 }
 0x170   :  { %521 = vmatprep.mubr.bf16.mxu1 %v343_v0  ;;  %2612 = vmatmul.mubr.bf16.vlgmr.msra.gmra.mrb[0].mxu0 %v344_v1 }
 0x171   :  { %2374 = vmatmul.mubr.msk.bf16.vlgmr.msra.gmra.mrb[4].mxu1 %vm2372_vm11, %v2373_v2 }
 0x172   :  { %708 = vmatpush1.bf16.msra.mxu1 %v3214_v3 }
 0x173   :  { %709 = vmatprep.subr.bf16.mxu1 %v4084_v4 }
 0x176   :  { %710 = vmatpush1.bf16.msra.mxu1 %v3222_v5 }
 0x177   :  { %711 = vmatprep.subr.bf16.mxu1 %v4084_v4 }
 0x17a   :  { %712 = vmatpush1.bf16.msra.mxu1 %v3229_v6 }
 0x17b   :  { %713 = vmatprep.subr.bf16.mxu1 %v4084_v4 }
 0x17e   :  { %714 = vmatpush1.bf16.msra.mxu1 %v3236_v7 }
 0x17f   :  { %715 = vmatprep.subr.bf16.mxu1 %v4084_v4 }
 0x182   :  { %716 = vmatpush1.bf16.msra.mxu1 %v3243_v8 }
 0x183   :  { %717 = vmatprep.subr.bf16.mxu1 %v4084_v4 }
 0x186   :  { %718 = vmatpush1.bf16.msra.mxu1 %v3250_v9 }
 0x187   :  { %719 = vmatprep.subr.bf16.mxu1 %v4084_v4 }
 0x18a   :  { %720 = vmatpush1.bf16.msra.mxu1 %v3257_v10 }
 0x18b   :  { %721 = vmatprep.subr.bf16.mxu1 %v4084_v4 }
 0x18e   :  { %722 = vmatpush1.bf16.msra.mxu1 %v3264_v11 }
 0x18f   :  { %723 = vmatprep.subr.bf16.mxu1 %v4084_v4 }
 0x192   :  { %724 = vmatpush1.bf16.msra.mxu1 %v3271_v13 }
 0x193   :  { %725 = vmatprep.subr.bf16.mxu1 %v4084_v4 }
 0x196   :  { %726 = vmatpush1.bf16.msra.mxu1 %v3278_v14 }
 0x197   :  { %727 = vmatprep.subr.bf16.mxu1 %v4084_v4 }
 0x19a   :  { %728 = vmatpush1.bf16.msra.mxu1 %v3297_v49 }
 0x19b   :  { %729 = vmatprep.subr.bf16.mxu1 %v4084_v4 }
 0x19e   :  { %730 = vmatpush1.bf16.msra.mxu1 %v3305_v52 }
 0x19f   :  { %1004 = vmatprep.subr.bf16.mxu1 %v4084_v4 }
 0x243   :  { %v563_v15 = vpop.f32.mrb[0].mxu0 }
 0x244   :  { %v2507_v16 = vpop.f32.mrb[4].mxu1  ;;  %v2613_v17 = vpop.f32.mrb[1].mxu0 }
 0x245   :  { %v2508_v18 = vpop.f32.mrb[5].mxu1  ;;  %v566_v19 = vpop.f32.mrb[2].mxu0 }
 0x246   :  { %v2509_v20 = vadd.f32 %v2508_v18, %v2507_v16  ;;  %v2510_v21 = vpop.f32.mrb[6].mxu1  ;;  %v2614_v22 = vpop.f32.mrb[3].mxu0 }
 0x247   :  { %v2511_v25 = vpop.f32.mrb[7].mxu1 }
 0x248   :  { %v564_v46 = vadd.f32 %v2509_v20, %v563_v15 }
 0x24a   :  { %v575_v48 = vmul.f32 %v3286_v23, %v564_v46 }
 0x24c   :  { %v582_v50 = vadd.f32 %v3291_v47, %v575_v48 }
 0x24e   :  { %vm583_vm12 = vcmp.gt.f32.partialorder %v582_v50, 0.0  ;;  %v584_v51 = vmul.f32 0.01, %v582_v50 }
 0x250   :  { %v3307_v53 = vsel %vm583_vm12, %v582_v50, %v584_v51 }
 0x251   :  { %4140 = vst [vmem:[#allocation16_spill] sm:$0xff] %v3307_v53  ;;  %v587_v54 = vrot.slane %v3307_v53, 2  ;;  %v589_v55 = vrot.slane %v3307_v53, 6  ;;  %v591_v56 = vrot.slane %v3307_v53, 4 }
 0x253   :  { %v593_v57 = vsel %vm329_vm9, %v587_v54, %v3307_v53  ;;  %v596_v58 = vsel %vm594_vm13, %v589_v55, %v591_v56  ;;  %v3342_v56 = vld [vmem:[%s4064_s9 + $0x10] sm:$0xff]  }
 0x254   :  { %v595_v59 = vsel %vm594_vm13, %v593_v57, %v589_v55  ;;  %v598_v60 = vsel %vm597_vm14, %v596_v58, %v587_v54  ;;  %v3329_v54 = vld [vmem:[%s4064_s9] sm:$0xff]   ;;  %v3335_v55 = vld [vmem:[%s4064_s9 + $0x8] sm:$0xff]   ;;  %v3349_v57 = vld [vmem:[%s4064_s9 + $0x18] sm:$0xff]  }
 0x255   :  { %v608_v62 = vrot.slane %v598_v60, 1  ;;  %v2690_v63 = vpack.i.bf16 %v598_v60, %v595_v59  ;;  %v607_v0 = vrot.slane %v595_v59, 1  ;;  %v612_v1 = vrot.slane %v595_v59, 2  ;;  %851 = vmatpush1.bf16.msra.mxu0 %v3329_v54  ;;  %v3356_v58 = vld [vmem:[%s4064_s9 + $0x20] sm:$0xff]   ;;  %v3363_v59 = vld [vmem:[%s4064_s9 + $0x28] sm:$0xff]  }
 0x256   :  { %v613_v2 = vrot.slane %v598_v60, 2  ;;  %852 = vmatprep.subr.bf16.mxu0 %v4084_v4  ;;  %v3370_v60 = vld [vmem:[%s4064_s9 + $0x30] sm:$0xff]  }
 0x257   :  { %2691 = vrot.lane.b32.xlu1 %v2690_v63, %s2903_s7  ;;  %v609_v15 = vsel %vm231_vm0, %v607_v0, %v608_v62  ;;  %v3384_v63 = vld [vmem:[%s4064_s9 + $0x40] sm:$0xff]   ;;  %v3391_v0 = vld [vmem:[%s4064_s9 + $0x48] sm:$0xff]  }
 0x258   :  { %v614_v16 = vsel %vm238_vm1, %v612_v1, %v613_v2  ;;  %v3398_v1 = vld [vmem:[%s4064_s9 + $0x50] sm:$0xff]  }
 0x259   :  { %v2695_v17 = vpack.i.bf16 %v613_v2, %v614_v16  ;;  %853 = vmatpush1.bf16.msra.mxu0 %v3335_v55  ;;  %v3406_v2 = vld [vmem:[%s4064_s9 + $0x58] sm:$0xff]  }
 0x25a   :  { %854 = vmatprep.subr.bf16.mxu0 %v4084_v4 }
 0x25b   :  { %2696 = vrot.lane.b32.xlu0 %v2695_v17, %s2903_s7 }
 0x25d   :  { %855 = vmatpush1.bf16.msra.mxu0 %v3342_v56 }
 0x25e   :  { %856 = vmatprep.subr.bf16.mxu0 %v4084_v4 }
 0x261   :  { %857 = vmatpush1.bf16.msra.mxu0 %v3349_v57 }
 0x262   :  { %858 = vmatprep.subr.bf16.mxu0 %v4084_v4 }
 0x265   :  { %859 = vmatpush1.bf16.msra.mxu0 %v3356_v58 }
 0x266   :  { %860 = vmatprep.subr.bf16.mxu0 %v4084_v4 }
 0x269   :  { %861 = vmatpush1.bf16.msra.mxu0 %v3363_v59 }
 0x26a   :  { %862 = vmatprep.subr.bf16.mxu0 %v4084_v4 }
 0x26d   :  { %863 = vmatpush1.bf16.msra.mxu0 %v3370_v60 }
 0x26e   :  { %864 = vmatprep.subr.bf16.mxu0 %v4084_v4 }
 0x2c9   :  { %v2692_v18 = vpop.permute.xlu1 %2691 }
 0x2ca   :  { %v2694_v19 = vunpack.i.h.bf16 %v2692_v18  ;;  %v2693_v20 = vunpack.i.l.bf16 %v2692_v18 }
 0x2cc   :  { %v623_v21 = vsel %vm621_vm15, %v2694_v19, %v608_v62  ;;  %v622_v22 = vsel %vm621_vm15, %v2693_v20, %v609_v15  ;;  %v3377_v62 = vld [vmem:[%s4064_s9 + $0x38] sm:$0xff]   ;;  %v3411_v15 = vld [vmem:[%s4063_s8] ss:$0 sm:$0xff] }
 0x2cd   :  { %v624_v25 = vpack.c.bf16 %v623_v21, %v622_v22  ;;  %v2697_v46 = vpop.permute.xlu0 %2696  ;;  %865 = vmatpush1.bf16.msra.mxu0 %v3377_v62  ;;  %4141 = vst [vmem:[#allocation17_spill] sm:$0xff] %v3411_v15 }
 0x2ce   :  { %v2699_v48 = vunpack.i.h.bf16 %v2697_v46  ;;  %v2698_v50 = vunpack.i.l.bf16 %v2697_v46  ;;  %866 = vmatprep.subr.bf16.mxu0 %v4084_v4 }
 0x2d0   :  { %v625_v51 = vpack.c.bf16 %v2699_v48, %v2698_v50 }
 0x2d1   :  { %867 = vmatpush1.bf16.msra.mxu0 %v3384_v63 }
 0x2d2   :  { %2390 = vmatprep.mubr.msk.bf16.mxu1 %vm621_vm15, %v625_v51  ;;  %868 = vmatprep.subr.bf16.mxu0 %v4084_v4 }
 0x2d3   :  { %740 = vmatmul.mubr.bf16.vlgmr.msra.gmra.mrb[8].mxu1 %v624_v25 }
 0x2d5   :  { %869 = vmatpush1.bf16.msra.mxu0 %v3391_v0 }
 0x2d6   :  { %870 = vmatprep.subr.bf16.mxu0 %v4084_v4 }
 0x2d9   :  { %871 = vmatpush1.bf16.msra.mxu0 %v3398_v1 }
 0x2da   :  { %872 = vmatprep.subr.bf16.mxu0 %v4084_v4 }
 0x2dd   :  { %873 = vmatpush1.bf16.msra.mxu0 %v3406_v2 }
 0x2de   :  { %1147 = vmatprep.subr.bf16.mxu0 %v4084_v4 }
 0x3a6   :  { %v741_v16 = vpop.f32.mrb[8].mxu1 }
 0x3a7   :  { %v742_v17 = vadd.f32 %v3411_v15, %v741_v16  ;;  %v743_v18 = vpop.f32.mrb[9].mxu1 }
 0x3a8   :  { %v744_v19 = vpop.f32.mrb[10].mxu1 }
 0x3a9   :  { %vm748_vm8 = vcmp.gt.f32.partialorder %v742_v17, 0.0  ;;  %v750_v20 = vmul.f32 0.01, %v742_v17  ;;  %v745_v21 = vadd.f32 %v3411_v15, %v744_v19  ;;  %v746_v22 = vpop.f32.mrb[11].mxu1 }
 0x3aa   :  { %v3459_v22 = vld [vmem:[%s4066_s11 + $0x28] sm:$0xff]  }
 0x3ab   :  { %v752_v25 = vsel %vm748_vm8, %v742_v17, %v750_v20  ;;  %vm749_vm12 = vcmp.gt.f32.partialorder %v745_v21, 0.0  ;;  %v751_v46 = vmul.f32 0.01, %v745_v21  ;;  %v3425_v20 = vld [vmem:[%s4066_s11] sm:$0xff]   ;;  %4148 = vst [vmem:[#allocation23_spill] sm:$0xff] %v3459_v22 }
 0x3ac   :  { %v762_v50 = vrot.slane %v752_v25, 2  ;;  %v756_v47 = vrot.slane %v752_v25, 1  ;;  %4142 = vst [vmem:[#allocation18_spill] sm:$0xff] %v3425_v20  ;;  %1005 = vmatpush1.bf16.msra.mxu1 %v3425_v20 }
 0x3ad   :  { %v753_v48 = vsel %vm749_vm12, %v745_v21, %v751_v46  ;;  %v3452_v21 = vld [vmem:[%s4066_s11 + $0x20] sm:$0xff]   ;;  %v3473_v46 = vld [vmem:[%s4066_s11 + $0x38] sm:$0xff]  }
 0x3ae   :  { %v757_v51 = vrot.slane %v753_v48, 1  ;;  %v763_v12 = vrot.slane %v753_v48, 2  ;;  %4147 = vst [vmem:[#allocation22_spill] sm:$0xff] %v3452_v21  ;;  %4150 = vst [vmem:[#allocation25_spill] sm:$0xff] %v3473_v46  ;;  %v3480_v48 = vld [vmem:[%s4066_s11 + $0x40] sm:$0xff]  }
 0x3af   :  { %4151 = vst [vmem:[#allocation26_spill] sm:$0xff] %v3480_v48 }
 0x3b0   :  { %v758_v4 = vsel %vm231_vm0, %v756_v47, %v757_v51  ;;  %v764_v23 = vsel %vm238_vm1, %v762_v50, %v763_v12  ;;  %v3431_v12 = vld [vmem:[%s4066_s11 + $0x8] sm:$0xff]   ;;  %v3445_v47 = vld [vmem:[%s4066_s11 + $0x18] sm:$0xff]   ;;  %v3494_v51 = vld [vmem:[%s4066_s11 + $0x50] sm:$0xff]  }
 0x3b1   :  { %759 = vrot.lane.b32.xlu1 %v758_v4, %s2903_s7  ;;  %v768_v16 = vpack.c.bf16 %v764_v23, %v764_v23  ;;  %4143 = vst [vmem:[#allocation19_spill] sm:$0xff] %v3431_v12  ;;  %v4144_v4 = vmov 0   ;;  %v3438_v23 = vld [vmem:[%s4066_s11 + $0x10] sm:$0xff]   ;;  %4146 = vst [vmem:[#allocation21_spill] sm:$0xff] %v3445_v47  ;;  %v3487_v50 = vld [vmem:[%s4066_s11 + $0x48] sm:$0xff]  }
 0x3b2   :  { %1006 = vmatprep.subr.bf16.mxu1 %v4144_v4  ;;  %4145 = vst [vmem:[#allocation20_spill] sm:$0xff] %v3438_v23  ;;  %4152 = vst [vmem:[#allocation27_spill] sm:$0xff] %v3487_v50 }
 0x3b3   :  { %2404 = vmatprep.mubr.msk.bf16.mxu0 %vm621_vm15, %v768_v16  ;;  %1007 = vmatpush1.bf16.msra.mxu1 %v3431_v12  ;;  %4153 = vst [vmem:[#allocation28_spill] sm:$0xff] %v3494_v51  ;;  %v3502_v16 = vld [vmem:[%s4065_s10] ss:$0 sm:$0xff] }
 0x3b4   :  { %1008 = vmatprep.subr.bf16.mxu1 %v4144_v4  ;;  %4154 = vst [vmem:[#allocation29_spill] sm:$0xff] %v3502_v16 }
 0x3b7   :  { %1009 = vmatpush1.bf16.msra.mxu1 %v3438_v23 }
 0x3b8   :  { %1010 = vmatprep.subr.bf16.mxu1 %v4144_v4 }
 0x3bb   :  { %1011 = vmatpush1.bf16.msra.mxu1 %v3445_v47 }
 0x3bc   :  { %1012 = vmatprep.subr.bf16.mxu1 %v4144_v4 }
 0x3bf   :  { %1013 = vmatpush1.bf16.msra.mxu1 %v3452_v21 }
 0x3c0   :  { %1014 = vmatprep.subr.bf16.mxu1 %v4144_v4 }
 0x3c3   :  { %1015 = vmatpush1.bf16.msra.mxu1 %v3459_v22 }
 0x3c4   :  { %1016 = vmatprep.subr.bf16.mxu1 %v4144_v4 }
 0x423   :  { %v760_v18 = vpop.permute.xlu1 %759 }
 0x424   :  { %v766_v19 = vsel %vm621_vm15, %v752_v25, %v760_v18  ;;  %v3466_v25 = vld [vmem:[%s4066_s11 + $0x30] sm:$0xff]  }
 0x425   :  { %v767_v17 = vpack.c.bf16 %v766_v19, %v766_v19  ;;  %4149 = vst [vmem:[#allocation24_spill] sm:$0xff] %v3466_v25  ;;  %1017 = vmatpush1.bf16.msra.mxu1 %v3466_v25  ;;  %v4157_v25 = vmov 0.0  }
 0x426   :  { %1018 = vmatprep.subr.bf16.mxu1 %v4144_v4 }
 0x427   :  { %883 = vmatmul.mubr.bf16.vlgmr.msra.gmra.mrb[4].mxu0 %v767_v17 }
 0x429   :  { %1019 = vmatpush1.bf16.msra.mxu1 %v3473_v46 }
 0x42a   :  { %1020 = vmatprep.subr.bf16.mxu1 %v4144_v4 }
 0x42d   :  { %1021 = vmatpush1.bf16.msra.mxu1 %v3480_v48  ;;  %v3508_v48 = vld [vmem:[%s4066_s11 + $0x58] sm:$0xff]  }
 0x42e   :  { %1022 = vmatprep.subr.bf16.mxu1 %v4144_v4  ;;  %4155 = vst [vmem:[#allocation30_spill] sm:$0xff] %v3508_v48 }
 0x431   :  { %1023 = vmatpush1.bf16.msra.mxu1 %v3487_v50 }
 0x432   :  { %1024 = vmatprep.subr.bf16.mxu1 %v4144_v4 }
 0x435   :  { %1025 = vmatpush1.bf16.msra.mxu1 %v3494_v51 }
 0x436   :  { %1026 = vmatprep.subr.bf16.mxu1 %v4144_v4 }
 0x439   :  { %1027 = vmatpush1.bf16.msra.mxu1 %v3508_v48 }
 0x43a   :  { %2615 = vmatprep.subr.bf16.mxu1 %v4157_v25 }
 0x4fa   :  { %v884_v18 = vpop.f32.mrb[4].mxu0 }
 0x4fb   :  { %v885_v19 = vadd.f32 %v3502_v16, %v884_v18  ;;  %v886_v17 = vpop.f32.mrb[5].mxu0 }
 0x4fc   :  { %v887_v15 = vpop.f32.mrb[6].mxu0 }
 0x4fd   :  { %2843 = vtanh.f32 %v885_v19  ;;  %v888_v50 = vpop.f32.mrb[7].mxu0  ;;  %v2434_v19 = vld [vmem:[%s4123_s29 + $0x18] sm:$0x7] }
 0x4fe   :  { %v2433_v50 = vld [vmem:[%s4123_s29 + $0x10] sm:$0xff]  ;;  %v1262_v16 = vrot.slane %v2434_v19, 1  ;;  %v1274_v14 = vrot.slane %v2434_v19, 3  ;;  %v1268_v11 = vrot.slane %v2434_v19, 2 }
 0x4ff   :  { %v1273_v49 = vrot.slane %v2433_v50, 3 }
 0x507   :  { %v2844_v51 = vpop.eup %2843 }
 0x508   :  { %v3511_v46 = vadd.f32 %v2844_v51, %v3307_v53  ;;  %v1261_v53 = vrot.slane %v2433_v50, 1 }
 0x50a   :  { %4156 = vst [vmem:[#allocation31_spill] sm:$0xff] %v3511_v46  ;;  %v893_v22 = vrot.slane %v3511_v46, 2  ;;  %v895_v18 = vrot.slane %v3511_v46, 6  ;;  %v897_v15 = vrot.slane %v3511_v46, 4  ;;  %v1263_v52 = vsel %vm231_vm0, %v1261_v53, %v1262_v16 }
 0x50b   :  { %1264 = vrot.lane.b32.xlu1 %v1263_v52, %s2897_s25 }
 0x50c   :  { %v899_v51 = vsel %vm329_vm9, %v893_v22, %v3511_v46  ;;  %v901_v17 = vsel %vm594_vm13, %v895_v18, %v897_v15  ;;  %v1267_v15 = vrot.slane %v2433_v50, 2 }
 0x50d   :  { %v900_v48 = vsel %vm594_vm13, %v899_v51, %v895_v18  ;;  %v902_v21 = vsel %vm597_vm14, %v901_v17, %v893_v22  ;;  %v1275_v22 = vsel %vm245_vm2, %v1273_v49, %v1274_v14  ;;  %v2858_v51 = vld [vmem:[%s4125_s6 + $0x90] sm:$0xff]   ;;  %v2859_v17 = vld [vmem:[%s4125_s6 + $0x98] sm:$0xff]  }
 0x50e   :  { %v914_v47 = vrot.slane %v900_v48, 2  ;;  %v915_v23 = vrot.slane %v902_v21, 2  ;;  %v905_v12 = vrot.slane %v900_v48, 1  ;;  %v906_v20 = vrot.slane %v902_v21, 1 }
 0x50f   :  { %v1269_v53 = vsel %vm238_vm1, %v1267_v15, %v1268_v11  ;;  %1276 = vrot.lane.b32.xlu1 %v1275_v22, %s2899_s27  ;;  %v3580_v15 = vld [vmem:[%s4068_s13] sm:$0xff]   ;;  %v3621_v22 = vld [vmem:[%s4068_s13 + $0x30] sm:$0xff]  }
 0x510   :  { %v916_v13 = vsel %vm238_vm1, %v914_v47, %v915_v23  ;;  %v907_v46 = vsel %vm231_vm0, %v905_v12, %v906_v20  ;;  %1148 = vmatpush1.bf16.msra.mxu0 %v3580_v15 }
 0x511   :  { %v922_v10 = vpack.c.bf16 %v915_v23, %v916_v13  ;;  %v2700_v18 = vpack.i.bf16 %v906_v20, %v907_v46  ;;  %v2855_v46 = vld [vmem:[%s4124_s1] sm:$0xff]   ;;  %1149 = vmatprep.subr.bf16.mxu0 %v4144_v4 }
 0x513   :  { %2418 = vmatprep.mubr.msk.bf16.mxu1 %vm621_vm15, %v922_v10  ;;  %2701 = vrot.lane.b32.xlu0 %v2700_v18, %s2903_s7  ;;  %v3614_v18 = vld [vmem:[%s4068_s13 + $0x28] sm:$0xff]  }
 0x517   :  { %1270 = vrot.lane.b32.xlu0 %v1269_v53, %s2901_s3  ;;  %v3628_v53 = vld [vmem:[%s4068_s13 + $0x38] sm:$0xff]  }
 0x518   :  { %4158 = vst [vmem:[#allocation32_spill] sm:$0xff] %v3628_v53 }
 0x57d   :  { %v1265_v47 = vpop.permute.xlu1 %1264 }
 0x57e   :  { %v1279_v19 = vsel %vm252_vm4, %v2433_v50, %v1265_v47  ;;  %v2857_v50 = vld [vmem:[%s4125_s6 + $0x88] sm:$0xff]   ;;  %v3635_v47 = vld [vmem:[%s4068_s13 + $0x40] sm:$0xff]  }
 0x57f   :  { %4159 = vst [vmem:[#allocation33_spill] sm:$0xff] %v3635_v47 }
 0x581   :  { %v1277_v20 = vpop.permute.xlu1 %1276 }
 0x585   :  { %v2702_v12 = vpop.permute.xlu0 %2701 }
 0x586   :  { %v2704_v16 = vunpack.i.h.bf16 %v2702_v12  ;;  %v2703_v52 = vunpack.i.l.bf16 %v2702_v12  ;;  %v3642_v12 = vld [vmem:[%s4068_s13 + $0x48] sm:$0xff]  }
 0x587   :  { %4160 = vst [vmem:[#allocation34_spill] sm:$0xff] %v3642_v12 }
 0x588   :  { %v920_v13 = vsel %vm621_vm15, %v902_v21, %v2704_v16  ;;  %v919_v14 = vsel %vm621_vm15, %v900_v48, %v2703_v52  ;;  %v2856_v48 = vld [vmem:[%s4125_s6 + $0x80] sm:$0xff]   ;;  %v3649_v16 = vld [vmem:[%s4068_s13 + $0x50] sm:$0xff]   ;;  %v3656_v52 = vld [vmem:[%s4068_s13 + $0x58] sm:$0xff]  }
 0x589   :  { %v921_v49 = vpack.c.bf16 %v920_v13, %v919_v14  ;;  %v1271_v10 = vpop.permute.xlu0 %1270  ;;  %4161 = vst [vmem:[#allocation35_spill] sm:$0xff] %v3649_v16  ;;  %4162 = vst [vmem:[#allocation36_spill] sm:$0xff] %v3656_v52  ;;  %v3666_v13 = vld [vmem:[%s4067_s12] ss:$0 sm:$0xff] }
 0x58a   :  { %v1280_v23 = vsel %vm254_vm5, %v1279_v19, %v1271_v10  ;;  %v2860_v19 = vld [vmem:[%s4125_s6 + $0x40] sm:$0xff]  }
 0x58b   :  { %1037 = vmatmul.mubr.bf16.vlgmr.msra.gmra.mrb[12].mxu1 %v921_v49  ;;  %v1281_v11 = vsel %vm256_vm6, %v1280_v23, %v1277_v20 }
 0x58c   :  { %2616 = vmatpush3.bf16.msra.mxu1 %v2855_v46  ;;  %2617 = vmatprep.mubr.msk.bf16.mxu1 %vm2900_vm3, %v4157_v25  ;;  %v1282_v21 = vpack.c.bf16 %v1281_v11, %v1281_v11 }
 0x58d   :  { %2621 = vmatprep.subr.bf16.mxu1 %v4157_v25 }
 0x593   :  { %2618 = vmatmul.mubr.msk.bf16.vlgmr.msra.gmra.mrb[16].mxu1 %vm265_vm7, %v1282_v21 }
 0x594   :  { %2622 = vmatpush3.bf16.msra.mxu1 %v2856_v48  ;;  %2637 = vmatprep.mubr.msk.bf16.mxu1 %vm2900_vm3, %v4157_v25 }
 0x595   :  { %2623 = vmatprep.subr.bf16.mxu1 %v4157_v25 }
 0x598   :  { %2624 = vmatpush3.bf16.msra.mxu1 %v2857_v50 }
 0x599   :  { %2625 = vmatprep.subr.bf16.mxu1 %v4157_v25 }
 0x59c   :  { %2626 = vmatpush3.bf16.msra.mxu1 %v2858_v51 }
 0x59d   :  { %2627 = vmatprep.subr.bf16.mxu1 %v4157_v25 }
 0x5a0   :  { %2628 = vmatpush3.bf16.msra.mxu1 %v2859_v17 }
 0x5a1   :  { %2629 = vmatprep.subr.bf16.mxu1 %v4157_v25 }
 0x5a4   :  { %2630 = vmatpush3.bf16.msra.mxu1 %v3115_v33  ;;  %v3586_v33 = vld [vmem:[%s4068_s13 + $0x8] sm:$0xff]  }
 0x5a5   :  { %2631 = vmatprep.subr.bf16.mxu1 %v4157_v25  ;;  %1150 = vmatpush1.bf16.msra.mxu0 %v3586_v33 }
 0x5a6   :  { %1151 = vmatprep.subr.bf16.mxu0 %v4144_v4 }
 0x5a8   :  { %2632 = vmatpush3.bf16.msra.mxu1 %v3134_v36  ;;  %v3593_v36 = vld [vmem:[%s4068_s13 + $0x10] sm:$0xff]  }
 0x5a9   :  { %2633 = vmatprep.subr.bf16.mxu1 %v4157_v25  ;;  %1152 = vmatpush1.bf16.msra.mxu0 %v3593_v36 }
 0x5aa   :  { %1153 = vmatprep.subr.bf16.mxu0 %v4144_v4 }
 0x5ac   :  { %2634 = vmatpush3.bf16.msra.mxu1 %v3153_v39  ;;  %v3600_v39 = vld [vmem:[%s4068_s13 + $0x18] sm:$0xff]  }
 0x5ad   :  { %2635 = vmatprep.subr.bf16.mxu1 %v4157_v25  ;;  %1154 = vmatpush1.bf16.msra.mxu0 %v3600_v39 }
 0x5ae   :  { %1155 = vmatprep.subr.bf16.mxu0 %v4144_v4 }
 0x5b0   :  { %2636 = vmatpush3.bf16.msra.mxu1 %v3172_v42  ;;  %v3607_v42 = vld [vmem:[%s4068_s13 + $0x20] sm:$0xff]  }
 0x5b1   :  { %1539 = vmatprep.subr.bf16.mxu1 %v4144_v4  ;;  %1156 = vmatpush1.bf16.msra.mxu0 %v3607_v42 }
 0x5b2   :  { %1157 = vmatprep.subr.bf16.mxu0 %v4144_v4 }
 0x5b5   :  { %1158 = vmatpush1.bf16.msra.mxu0 %v3614_v18 }
 0x5b6   :  { %1159 = vmatprep.subr.bf16.mxu0 %v4144_v4 }
 0x5b9   :  { %1160 = vmatpush1.bf16.msra.mxu0 %v3621_v22 }
 0x5ba   :  { %1161 = vmatprep.subr.bf16.mxu0 %v4144_v4 }
 0x5bd   :  { %1162 = vmatpush1.bf16.msra.mxu0 %v3628_v53 }
 0x5be   :  { %1163 = vmatprep.subr.bf16.mxu0 %v4144_v4 }
 0x5c1   :  { %1164 = vmatpush1.bf16.msra.mxu0 %v3635_v47 }
 0x5c2   :  { %1165 = vmatprep.subr.bf16.mxu0 %v4144_v4 }
 0x5c5   :  { %1166 = vmatpush1.bf16.msra.mxu0 %v3642_v12 }
 0x5c6   :  { %1167 = vmatprep.subr.bf16.mxu0 %v4144_v4 }
 0x5c9   :  { %1168 = vmatpush1.bf16.msra.mxu0 %v3649_v16 }
 0x5ca   :  { %1169 = vmatprep.subr.bf16.mxu0 %v4144_v4 }
 0x5cd   :  { %1170 = vmatpush1.bf16.msra.mxu0 %v3656_v52 }
 0x5ce   :  { %2524 = vmatprep.subr.bf16.mxu0 %v2860_v19 }
 0x65e   :  { %v1038_v14 = vpop.f32.mrb[12].mxu1 }
 0x65f   :  { %v1039_v49 = vadd.f32 %v3666_v13, %v1038_v14  ;;  %v1040_v10 = vpop.f32.mrb[13].mxu1 }
 0x660   :  { %v1041_v20 = vpop.f32.mrb[14].mxu1 }
 0x661   :  { %vm1045_vm2 = vcmp.gt.f32.partialorder %v1039_v49, 0.0  ;;  %v1047_v23 = vmul.f32 0.01, %v1039_v49  ;;  %v1042_v11 = vadd.f32 %v3666_v13, %v1041_v20  ;;  %v1043_v46 = vpop.f32.mrb[15].mxu1 }
 0x663   :  { %v1049_v21 = vsel %vm1045_vm2, %v1039_v49, %v1047_v23  ;;  %vm1046_vm4 = vcmp.gt.f32.partialorder %v1042_v11, 0.0  ;;  %v1048_v48 = vmul.f32 0.01, %v1042_v11 }
 0x664   :  { %v1059_v51 = vrot.slane %v1049_v21, 2  ;;  %v1053_v52 = vrot.slane %v1049_v21, 1 }
 0x665   :  { %v1050_v50 = vsel %vm1046_vm4, %v1042_v11, %v1048_v48 }
 0x666   :  { %v1054_v17 = vrot.slane %v1050_v50, 1  ;;  %v1060_v19 = vrot.slane %v1050_v50, 2  ;;  %v1320_v16 = vpop.f32.mrb[16].mxu1 }
 0x667   :  { %v1326_v12 = vmul.f32 %v3185_v44, %v1320_v16  ;;  %v2619_v47 = vpop.f32.mrb[17].mxu1 }
 0x668   :  { %v1055_v14 = vsel %vm231_vm0, %v1053_v52, %v1054_v17  ;;  %v1061_v10 = vsel %vm238_vm1, %v1059_v51, %v1060_v19  ;;  %v1323_v53 = vpop.f32.mrb[18].mxu1 }
 0x669   :  { %1056 = vrot.lane.b32.xlu0 %v1055_v14, %s2903_s7  ;;  %v1065_v20 = vpack.c.bf16 %v1061_v10, %v1061_v10  ;;  %v1327_v49 = vadd.f32 %v3190_v45, %v1326_v12  ;;  %v2620_v23 = vpop.f32.mrb[19].mxu1 }
 0x66b   :  { %2432 = vmatprep.mubr.msk.bf16.mxu0 %vm621_vm15, %v1065_v20  ;;  %vm1328_vm5 = vcmp.gt.f32.partialorder %v1327_v49, 0.0  ;;  %v1329_v11 = vmul.f32 0.01, %v1327_v49 }
 0x66d   :  { %v1330_v46 = vsel %vm1328_vm5, %v1327_v49, %v1329_v11 }
 0x66e   :  { %v1332_v48 = vrot.slane %v1330_v46, 7 }
 0x670   :  { %v1334_v44 = vsel %vm329_vm9, 0.0, %v1332_v48  ;;  %v1335_v47 = vsel %vm329_vm9, %v1332_v48, 0.0 }
 0x671   :  { %v1342_v16 = vrot.slane %v1334_v44, 2  ;;  %v1343_v52 = vrot.slane %v1335_v47, 2  ;;  %v1338_v51 = vrot.slane %v1334_v44, 1  ;;  %v1339_v17 = vrot.slane %v1335_v47, 1 }
 0x673   :  { %v1344_v53 = vsel %vm238_vm1, %v1342_v16, %v1343_v52  ;;  %v1340_v45 = vsel %vm231_vm0, %v1338_v51, %v1339_v17 }
 0x674   :  { %v1348_v50 = vpack.c.bf16 %v1344_v53, %v1344_v53 }
 0x676   :  { %2638 = vmatmul.mubr.bf16.vlgmr.msra.gmra.mrb[20].mxu1 %v1348_v50 }
 0x677   :  { %1540 = vmatpush1.bf16.msra.mxu1 %v3329_v54 }
 0x678   :  { %1541 = vmatprep.subr.bf16.mxu1 %v4144_v4 }
 0x67b   :  { %1542 = vmatpush1.bf16.msra.mxu1 %v3335_v55 }
 0x67c   :  { %1543 = vmatprep.subr.bf16.mxu1 %v4144_v4 }
 0x67f   :  { %1544 = vmatpush1.bf16.msra.mxu1 %v3342_v56  ;;  %v1347_v56 = vpack.c.bf16 %v1340_v45, %v1340_v45 }
 0x680   :  { %1545 = vmatprep.subr.bf16.mxu1 %v4144_v4 }
 0x683   :  { %1546 = vmatpush1.bf16.msra.mxu1 %v3349_v57 }
 0x684   :  { %1547 = vmatprep.subr.bf16.mxu1 %v4144_v4 }
 0x687   :  { %1548 = vmatpush1.bf16.msra.mxu1 %v3356_v58 }
 0x688   :  { %1549 = vmatprep.subr.bf16.mxu1 %v4144_v4 }
 0x68b   :  { %1550 = vmatpush1.bf16.msra.mxu1 %v3363_v59  ;;  %v4170_v59 = vld [vmem:[#allocation13_spill] sm:$0xff] }
 0x68c   :  { %1551 = vmatprep.subr.bf16.mxu1 %v4144_v4 }
 0x68f   :  { %1552 = vmatpush1.bf16.msra.mxu1 %v3370_v60 }
 0x690   :  { %1553 = vmatprep.subr.bf16.mxu1 %v4144_v4 }
 0x693   :  { %1554 = vmatpush1.bf16.msra.mxu1 %v3377_v62 }
 0x694   :  { %1555 = vmatprep.subr.bf16.mxu1 %v4144_v4 }
 0x697   :  { %1556 = vmatpush1.bf16.msra.mxu1 %v3384_v63 }
 0x698   :  { %1557 = vmatprep.subr.bf16.mxu1 %v4144_v4 }
 0x69b   :  { %1558 = vmatpush1.bf16.msra.mxu1 %v3391_v0 }
 0x69c   :  { %1559 = vmatprep.subr.bf16.mxu1 %v4144_v4 }
 0x69f   :  { %1560 = vmatpush1.bf16.msra.mxu1 %v3398_v1 }
 0x6a0   :  { %1561 = vmatprep.subr.bf16.mxu1 %v4144_v4 }
 0x6a3   :  { %1562 = vmatpush1.bf16.msra.mxu1 %v3406_v2 }
 0x6a4   :  { %1680 = vmatprep.subr.bf16.mxu1 %v4144_v4 }
 0x6db   :  { %v1057_v54 = vpop.permute.xlu0 %1056 }
 0x6dc   :  { %v1063_v55 = vsel %vm621_vm15, %v1049_v21, %v1057_v54 }
 0x6dd   :  { %v1064_v57 = vpack.c.bf16 %v1063_v55, %v1063_v55 }
 0x6df   :  { %1180 = vmatmul.mubr.bf16.vlgmr.msra.gmra.mrb[8].mxu0 %v1064_v57  ;;  %v4172_v57 = vld [vmem:[#allocation19_spill] sm:$0xff] }
 0x6e0   :  { %2525 = vmatpush3.bf16.msra.mxu0 %v3067_v24  ;;  %1381 = vmatprep.mubr.bf16.mxu0 %v1347_v56  ;;  %v2439_v24 = vpack.c.bf16 %v1332_v48, %v1332_v48  ;;  %v4171_v56 = vld [vmem:[#allocation18_spill] sm:$0xff] }
 0x6e1   :  { %2526 = vmatprep.subr.bf16.mxu0 %v3072_v26  ;;  %v4163_v26 = vld [vmem:[#allocation8_spill] sm:$0xff] }
 0x6e4   :  { %2527 = vmatpush3.bf16.msra.mxu0 %v3079_v27  ;;  %v4164_v27 = vld [vmem:[#allocation9_spill] sm:$0xff] }
 0x6e5   :  { %2528 = vmatprep.subr.bf16.mxu0 %v3085_v28  ;;  %v4165_v28 = vld [vmem:[#allocation10_spill] sm:$0xff] }
 0x6e8   :  { %2529 = vmatpush3.bf16.msra.mxu0 %v3091_v29  ;;  %v4166_v29 = vld [vmem:[#allocation11_spill] sm:$0xff] }
 0x6e9   :  { %2530 = vmatprep.subr.bf16.mxu0 %v3097_v30  ;;  %v4167_v30 = vld [vmem:[#allocation14_spill] sm:$0xff] }
 0x6ec   :  { %2531 = vmatpush3.bf16.msra.mxu0 %v3103_v31  ;;  %v4168_v31 = vld [vmem:[#allocation15_spill] sm:$0xff] }
 0x6ed   :  { %2532 = vmatprep.subr.bf16.mxu0 %v3110_v32 }
 0x6f0   :  { %2533 = vmatpush3.bf16.msra.mxu0 %v3120_v34 }
 0x6f1   :  { %2534 = vmatprep.subr.bf16.mxu0 %v3129_v35 }
 0x6f4   :  { %2535 = vmatpush3.bf16.msra.mxu0 %v3139_v37 }
 0x6f5   :  { %2536 = vmatprep.subr.bf16.mxu0 %v3148_v38 }
 0x6f8   :  { %2537 = vmatpush3.bf16.msra.mxu0 %v3158_v40 }
 0x6f9   :  { %2538 = vmatprep.subr.bf16.mxu0 %v3167_v41 }
 0x6fc   :  { %2539 = vmatpush3.bf16.msra.mxu0 %v3177_v43 }
 0x6fd   :  { %1474 = vmatprep.subr.bf16.mxu0 %v4144_v4 }
 0x6ff   :  { %2440 = vmatmul.mubr.msk.bf16.vlgmr.msra.gmra.mrb[12].mxu0 %vm2372_vm11, %v2439_v24  ;;  %v4173_v24 = vld [vmem:[#allocation20_spill] sm:$0xff] }
 0x700   :  { %1475 = vmatpush1.bf16.msra.mxu0 %v3214_v3 }
 0x701   :  { %1476 = vmatprep.subr.bf16.mxu0 %v4144_v4 }
 0x704   :  { %1477 = vmatpush1.bf16.msra.mxu0 %v3222_v5 }
 0x705   :  { %1478 = vmatprep.subr.bf16.mxu0 %v4144_v4 }
 0x708   :  { %1479 = vmatpush1.bf16.msra.mxu0 %v3229_v6 }
 0x709   :  { %1480 = vmatprep.subr.bf16.mxu0 %v4144_v4 }
 0x70c   :  { %1481 = vmatpush1.bf16.msra.mxu0 %v3236_v7 }
 0x70d   :  { %1482 = vmatprep.subr.bf16.mxu0 %v4144_v4 }
 0x710   :  { %1483 = vmatpush1.bf16.msra.mxu0 %v3243_v8 }
 0x711   :  { %1484 = vmatprep.subr.bf16.mxu0 %v4144_v4 }
 0x714   :  { %1485 = vmatpush1.bf16.msra.mxu0 %v3250_v9  ;;  %v4169_v9 = vld [vmem:[#allocation12_spill] sm:$0xff] }
 0x715   :  { %1486 = vmatprep.subr.bf16.mxu0 %v4144_v4 }
 0x718   :  { %1487 = vmatpush1.bf16.msra.mxu0 %v4163_v26  ;;  %v4174_v26 = vld [vmem:[#allocation21_spill] sm:$0xff] }
 0x719   :  { %1488 = vmatprep.subr.bf16.mxu0 %v4144_v4 }
 0x71c   :  { %1489 = vmatpush1.bf16.msra.mxu0 %v4164_v27  ;;  %v4175_v27 = vld [vmem:[#allocation22_spill] sm:$0xff] }
 0x71d   :  { %1490 = vmatprep.subr.bf16.mxu0 %v4144_v4 }
 0x720   :  { %1491 = vmatpush1.bf16.msra.mxu0 %v4165_v28  ;;  %v4176_v28 = vld [vmem:[#allocation23_spill] sm:$0xff] }
 0x721   :  { %1492 = vmatprep.subr.bf16.mxu0 %v4144_v4 }
 0x724   :  { %1493 = vmatpush1.bf16.msra.mxu0 %v4166_v29  ;;  %v4177_v29 = vld [vmem:[#allocation24_spill] sm:$0xff] }
 0x725   :  { %1494 = vmatprep.subr.bf16.mxu0 %v4144_v4 }
 0x728   :  { %1495 = vmatpush1.bf16.msra.mxu0 %v4167_v30  ;;  %v4178_v30 = vld [vmem:[#allocation25_spill] sm:$0xff] }
 0x729   :  { %1496 = vmatprep.subr.bf16.mxu0 %v4144_v4 }
 0x72c   :  { %1497 = vmatpush1.bf16.msra.mxu0 %v4168_v31  ;;  %v4179_v31 = vld [vmem:[#allocation26_spill] sm:$0xff] }
 0x72d   :  { %1615 = vmatprep.subr.bf16.mxu0 %v4144_v4 }
 0x749   :  { %v1423_v32 = vpop.f32.mrb[20].mxu1 }
 0x74a   :  { %v2639_v34 = vpop.f32.mrb[21].mxu1 }
 0x74b   :  { %v1426_v35 = vpop.f32.mrb[22].mxu1  ;;  %v4181_v34 = vld [vmem:[#allocation28_spill] sm:$0xff] }
 0x74c   :  { %v2640_v37 = vpop.f32.mrb[23].mxu1  ;;  %v4182_v35 = vld [vmem:[#allocation30_spill] sm:$0xff] }
 0x7b2   :  { %v3750_v38 = vpop.f32.mrb[8].mxu0 }
 0x7b3   :  { %v1183_v40 = vpop.f32.mrb[9].mxu0 }
 0x7b4   :  { %v1184_v41 = vpop.f32.mrb[10].mxu0  ;;  %v4183_v40 = vld [vmem:[#allocation17_spill] sm:$0xff] }
 0x7b5   :  { %v1185_v43 = vpop.f32.mrb[11].mxu0 }
 0x7d2   :  { %v2540_v61 = vpop.f32.mrb[12].mxu0 }
 0x7d3   :  { %v2541_v3 = vpop.f32.mrb[13].mxu0 }
 0x7d4   :  { %v2542_v5 = vadd.f32 %v2541_v3, %v2540_v61  ;;  %v2543_v6 = vpop.f32.mrb[14].mxu0 }
 0x7d5   :  { %v2544_v7 = vpop.f32.mrb[15].mxu0 }
 0x7d6   :  { %v1424_v8 = vadd.f32 %v2542_v5, %v1423_v32  ;;  %v4180_v32 = vld [vmem:[#allocation27_spill] sm:$0xff] }
 0x7d8   :  { %v1429_v58 = vmul.f32 %v4169_v9, %v1424_v8 }
 0x7da   :  { %v1430_v60 = vadd.f32 %v4170_v59, %v1429_v58 }
 0x7dc   :  { %vm1431_vm6 = vcmp.gt.f32.partialorder %v1430_v60, 0.0  ;;  %v1432_v62 = vmul.f32 0.01, %v1430_v60 }
 0x7de   :  { %v3754_v63 = vsel %vm1431_vm6, %v1430_v60, %v1432_v62 }
 0x7df   :  { %v1435_v0 = vrot.slane %v3754_v63, 2  ;;  %v1437_v1 = vrot.slane %v3754_v63, 6  ;;  %v1439_v2 = vrot.slane %v3754_v63, 4 }
 0x7e1   :  { %v1441_v12 = vsel %vm329_vm9, %v1435_v0, %v3754_v63  ;;  %v1443_v21 = vsel %vm594_vm13, %v1437_v1, %v1439_v2 }
 0x7e2   :  { %v1442_v19 = vsel %vm594_vm13, %v1441_v12, %v1437_v1  ;;  %v1444_v14 = vsel %vm597_vm14, %v1443_v21, %v1435_v0 }
 0x7e3   :  { %v1454_v10 = vrot.slane %v1444_v14, 1  ;;  %v2705_v20 = vpack.i.bf16 %v1444_v14, %v1442_v19  ;;  %v1453_v49 = vrot.slane %v1442_v19, 1  ;;  %v1458_v23 = vrot.slane %v1442_v19, 2 }
 0x7e4   :  { %v1459_v11 = vrot.slane %v1444_v14, 2 }
 0x7e5   :  { %2706 = vrot.lane.b32.xlu1 %v2705_v20, %s2903_s7  ;;  %v1455_v46 = vsel %vm231_vm0, %v1453_v49, %v1454_v10 }
 0x7e6   :  { %v1460_v48 = vsel %vm238_vm1, %v1458_v23, %v1459_v11 }
 0x7e7   :  { %v2710_v44 = vpack.i.bf16 %v1459_v11, %v1460_v48 }
 0x7e9   :  { %2711 = vrot.lane.b32.xlu0 %v2710_v44, %s2903_s7 }
 0x857   :  { %v2707_v47 = vpop.permute.xlu1 %2706 }
 0x858   :  { %v2709_v16 = vunpack.i.h.bf16 %v2707_v47  ;;  %v2708_v52 = vunpack.i.l.bf16 %v2707_v47 }
 0x85a   :  { %v1468_v53 = vsel %vm621_vm15, %v2709_v16, %v1454_v10  ;;  %v1467_v50 = vsel %vm621_vm15, %v2708_v52, %v1455_v46 }
 0x85b   :  { %v1469_v51 = vpack.c.bf16 %v1468_v53, %v1467_v50  ;;  %v2712_v17 = vpop.permute.xlu0 %2711 }
 0x85c   :  { %v2714_v45 = vunpack.i.h.bf16 %v2712_v17  ;;  %v2713_v54 = vunpack.i.l.bf16 %v2712_v17 }
 0x85e   :  { %v1470_v55 = vpack.c.bf16 %v2714_v45, %v2713_v54 }
 0x860   :  { %2441 = vmatprep.mubr.msk.bf16.mxu0 %vm621_vm15, %v1470_v55 }
 0x861   :  { %1507 = vmatmul.mubr.bf16.vlgmr.msra.gmra.mrb[16].mxu0 %v1469_v51 }
 0x862   :  { %1616 = vmatpush1.bf16.msra.mxu0 %v4171_v56 }
 0x863   :  { %1617 = vmatprep.subr.bf16.mxu0 %v4144_v4 }
 0x866   :  { %1618 = vmatpush1.bf16.msra.mxu0 %v4172_v57 }
 0x867   :  { %1619 = vmatprep.subr.bf16.mxu0 %v4144_v4 }
 0x86a   :  { %1620 = vmatpush1.bf16.msra.mxu0 %v4173_v24 }
 0x86b   :  { %1621 = vmatprep.subr.bf16.mxu0 %v4144_v4 }
 0x86e   :  { %1622 = vmatpush1.bf16.msra.mxu0 %v4174_v26 }
 0x86f   :  { %1623 = vmatprep.subr.bf16.mxu0 %v4144_v4 }
 0x872   :  { %1624 = vmatpush1.bf16.msra.mxu0 %v4175_v27 }
 0x873   :  { %1625 = vmatprep.subr.bf16.mxu0 %v4144_v4 }
 0x876   :  { %1626 = vmatpush1.bf16.msra.mxu0 %v4176_v28 }
 0x877   :  { %1627 = vmatprep.subr.bf16.mxu0 %v4144_v4 }
 0x87a   :  { %1628 = vmatpush1.bf16.msra.mxu0 %v4177_v29 }
 0x87b   :  { %1629 = vmatprep.subr.bf16.mxu0 %v4144_v4 }
 0x87e   :  { %1630 = vmatpush1.bf16.msra.mxu0 %v4178_v30 }
 0x87f   :  { %1631 = vmatprep.subr.bf16.mxu0 %v4144_v4 }
 0x882   :  { %1632 = vmatpush1.bf16.msra.mxu0 %v4179_v31 }
 0x883   :  { %1633 = vmatprep.subr.bf16.mxu0 %v4144_v4 }
 0x886   :  { %1634 = vmatpush1.bf16.msra.mxu0 %v4180_v32 }
 0x887   :  { %1635 = vmatprep.subr.bf16.mxu0 %v4144_v4 }
 0x88a   :  { %1636 = vmatpush1.bf16.msra.mxu0 %v4181_v34  ;;  %v4190_v34 = vld [vmem:[#allocation31_spill] sm:$0xff] }
 0x88b   :  { %1637 = vmatprep.subr.bf16.mxu0 %v4144_v4 }
 0x88e   :  { %1638 = vmatpush1.bf16.msra.mxu0 %v4182_v35  ;;  %v3846_v35 = vsel %vm621_vm15, %v4190_v34, 0.0 }
 0x88f   :  { %2641 = vmatprep.subr.bf16.mxu0 %v4157_v25 }
 0x934   :  { %v1508_v37 = vpop.f32.mrb[16].mxu0 }
 0x935   :  { %v1509_v41 = vadd.f32 %v4183_v40, %v1508_v37  ;;  %v1510_v43 = vpop.f32.mrb[17].mxu0  ;;  %v1240_v37 = vrot.slane %v3846_v35, 4 }
 0x936   :  { %v1511_v61 = vpop.f32.mrb[18].mxu0 }
 0x937   :  { %vm1515_vm7 = vcmp.gt.f32.partialorder %v1509_v41, 0.0  ;;  %v1517_v3 = vmul.f32 0.01, %v1509_v41  ;;  %v1512_v5 = vadd.f32 %v4183_v40, %v1511_v61  ;;  %v1513_v6 = vpop.f32.mrb[19].mxu0  ;;  %v2419_v40 = vld [vmem:[%s4069_s14] ss:$0 sm:$0xff] }
 0x938   :  { %v1182_v43 = vadd.f32 %v2419_v40, %v3750_v38 }
 0x939   :  { %v1519_v7 = vsel %vm1515_vm7, %v1509_v41, %v1517_v3  ;;  %vm1516_vm10 = vcmp.gt.f32.partialorder %v1512_v5, 0.0  ;;  %v1518_v8 = vmul.f32 0.01, %v1512_v5  ;;  %v1241_v3 = vadd.f32 %v1240_v37, %v3846_v35 }
 0x93a   :  { %v1529_v58 = vrot.slane %v1519_v7, 2  ;;  %v1523_v62 = vrot.slane %v1519_v7, 1 }
 0x93b   :  { %v1520_v9 = vsel %vm1516_vm10, %v1512_v5, %v1518_v8 }
 0x93c   :  { %v1524_v59 = vrot.slane %v1520_v9, 1  ;;  %v1530_v60 = vrot.slane %v1520_v9, 2 }
 0x93e   :  { %v1525_v0 = vsel %vm231_vm0, %v1523_v62, %v1524_v59  ;;  %v1531_v1 = vsel %vm238_vm1, %v1529_v58, %v1530_v60  ;;  %v1242_v60 = vrot.slane %v1241_v3, 2 }
 0x93f   :  { %1526 = vrot.lane.b32.xlu1 %v1525_v0, %s2903_s7  ;;  %v1535_v2 = vpack.c.bf16 %v1531_v1, %v1531_v1 }
 0x941   :  { %2442 = vmatprep.mubr.msk.bf16.mxu1 %vm621_vm15, %v1535_v2 }
 0x9b1   :  { %v1527_v12 = vpop.permute.xlu1 %1526 }
 0x9b2   :  { %v1533_v21 = vsel %vm621_vm15, %v1519_v7, %v1527_v12 }
 0x9b3   :  { %v1534_v19 = vpack.c.bf16 %v1533_v21, %v1533_v21 }
 0x9b5   :  { %1572 = vmatmul.mubr.bf16.vlgmr.msra.gmra.mrb[24].mxu1 %v1534_v19 }
 0x9b6   :  { %1681 = vmatpush1.bf16.msra.mxu1 %v3580_v15  ;;  %v4184_v15 = vld [vmem:[#allocation32_spill] sm:$0xff] }
 0x9b7   :  { %1682 = vmatprep.subr.bf16.mxu1 %v4144_v4 }
 0x9ba   :  { %1683 = vmatpush1.bf16.msra.mxu1 %v3586_v33  ;;  %v4185_v33 = vld [vmem:[#allocation33_spill] sm:$0xff] }
 0x9bb   :  { %1684 = vmatprep.subr.bf16.mxu1 %v4144_v4 }
 0x9be   :  { %1685 = vmatpush1.bf16.msra.mxu1 %v3593_v36  ;;  %v4186_v36 = vld [vmem:[#allocation34_spill] sm:$0xff] }
 0x9bf   :  { %1686 = vmatprep.subr.bf16.mxu1 %v4144_v4 }
 0x9c2   :  { %1687 = vmatpush1.bf16.msra.mxu1 %v3600_v39  ;;  %v4187_v39 = vld [vmem:[#allocation35_spill] sm:$0xff] }
 0x9c3   :  { %1688 = vmatprep.subr.bf16.mxu1 %v4144_v4 }
 0x9c6   :  { %1689 = vmatpush1.bf16.msra.mxu1 %v3607_v42  ;;  %v4188_v42 = vld [vmem:[#allocation36_spill] sm:$0xff] }
 0x9c7   :  { %1690 = vmatprep.subr.bf16.mxu1 %v4144_v4 }
 0x9ca   :  { %1691 = vmatpush1.bf16.msra.mxu1 %v3614_v18 }
 0x9cb   :  { %1692 = vmatprep.subr.bf16.mxu1 %v4144_v4 }
 0x9ce   :  { %1693 = vmatpush1.bf16.msra.mxu1 %v3621_v22  ;;  %v4189_v22 = vld [vmem:[#allocation29_spill] sm:$0xff] }
 0x9cf   :  { %1694 = vmatprep.subr.bf16.mxu1 %v4144_v4 }
 0x9d2   :  { %1695 = vmatpush1.bf16.msra.mxu1 %v4184_v15 }
 0x9d3   :  { %1696 = vmatprep.subr.bf16.mxu1 %v4144_v4 }
 0x9d6   :  { %1697 = vmatpush1.bf16.msra.mxu1 %v4185_v33  ;;  %v1243_v33 = vadd.f32 %v1242_v60, %v1241_v3  ;;  %v2800_v3 = vld [vmem:[%s4070_s15 + $0x38] sm:$0xff]  }
 0x9d7   :  { %1698 = vmatprep.subr.bf16.mxu1 %v4144_v4 }
 0x9da   :  { %1699 = vmatpush1.bf16.msra.mxu1 %v4186_v36 }
 0x9db   :  { %1700 = vmatprep.subr.bf16.mxu1 %v4144_v4 }
 0x9de   :  { %1701 = vmatpush1.bf16.msra.mxu1 %v4187_v39 }
 0x9df   :  { %1702 = vmatprep.subr.bf16.mxu1 %v4144_v4 }
 0x9e2   :  { %1703 = vmatpush1.bf16.msra.mxu1 %v4188_v42 }
 0x9e3   :  { %2661 = vmatprep.subr.bf16.mxu1 %v4157_v25 }
 0xa88   :  { %v1573_v18 = vpop.f32.mrb[24].mxu1 }
 0xa89   :  { %v1574_v14 = vadd.f32 %v4189_v22, %v1573_v18  ;;  %v1575_v10 = vpop.f32.mrb[25].mxu1  ;;  %v1244_v18 = vrot.slane %v1243_v33, 1 }
 0xa8a   :  { %v1576_v20 = vpop.f32.mrb[26].mxu1 }
 0xa8b   :  { %2845 = vtanh.f32 %v1574_v14  ;;  %v1577_v49 = vpop.f32.mrb[27].mxu1  ;;  %v1245_v10 = vadd.f32 %v1244_v18, %v1243_v33 }
 0xa8c   :  { %2847 = vtanh.f32 %v1182_v43 }
 0xa8d   :  { %v1246_v20 = vmul.f32 0.125, %v1245_v10 }
 0xa95   :  { %v2846_v23 = vpop.eup %2845 }
 0xa96   :  { %v1580_v11 = vadd.f32 %v2846_v23, %v3754_v63  ;;  %v2848_v22 = vpop.eup %2847 }
 0xa98   :  { %v1582_v46 = vrot.slane %v1580_v11, 2  ;;  %v1584_v48 = vrot.slane %v1580_v11, 6  ;;  %v1586_v44 = vrot.slane %v1580_v11, 4  ;;  %v3841_v31 = vsel %vm621_vm15, %v1580_v11, 0.0 }
 0xa99   :  { %v1771_v32 = vrot.slane %v3841_v31, 4 }
 0xa9a   :  { %v1588_v47 = vsel %vm329_vm9, %v1582_v46, %v1580_v11  ;;  %v1590_v16 = vsel %vm594_vm13, %v1584_v48, %v1586_v44 }
 0xa9b   :  { %v1589_v52 = vsel %vm594_vm13, %v1588_v47, %v1584_v48  ;;  %v1591_v53 = vsel %vm597_vm14, %v1590_v16, %v1582_v46  ;;  %v1772_v41 = vadd.f32 %v1771_v32, %v3841_v31 }
 0xa9c   :  { %v1603_v50 = vrot.slane %v1589_v52, 2  ;;  %v1604_v51 = vrot.slane %v1591_v53, 2  ;;  %v1594_v17 = vrot.slane %v1589_v52, 1  ;;  %v1595_v45 = vrot.slane %v1591_v53, 1 }
 0xa9d   :  { %v1773_v7 = vrot.slane %v1772_v41, 2 }
 0xa9e   :  { %v1605_v54 = vsel %vm238_vm1, %v1603_v50, %v1604_v51  ;;  %v1596_v55 = vsel %vm231_vm0, %v1594_v17, %v1595_v45  ;;  %v2794_v50 = vld [vmem:[%s4070_s15 + $0x8] sm:$0xff]  }
 0xa9f   :  { %v1611_v56 = vpack.c.bf16 %v1604_v51, %v1605_v54  ;;  %v2715_v57 = vpack.i.bf16 %v1595_v45, %v1596_v55  ;;  %v1774_v1 = vadd.f32 %v1773_v7, %v1772_v41  ;;  %v2795_v51 = vld [vmem:[%s4070_s15 + $0x10] sm:$0xff]   ;;  %v4191_v45 = vld [vmem:[#allocation16_spill] sm:$0xff]  ;;  %v2796_v55 = vld [vmem:[%s4070_s15 + $0x18] sm:$0xff]  }
 0xaa1   :  { %2443 = vmatprep.mubr.msk.bf16.mxu0 %vm621_vm15, %v1611_v56  ;;  %2716 = vrot.lane.b32.xlu0 %v2715_v57, %s2903_s7  ;;  %v1775_v15 = vrot.slane %v1774_v1, 1  ;;  %v2797_v57 = vld [vmem:[%s4070_s15 + $0x20] sm:$0xff]  }
 0xaa3   :  { %v1776_v42 = vadd.f32 %v1775_v15, %v1774_v1 }
 0xaa5   :  { %v1777_v14 = vmul.f32 0.125, %v1776_v42 }
 0xb13   :  { %v2717_v24 = vpop.permute.xlu0 %2716 }
 0xb14   :  { %v2719_v26 = vunpack.i.h.bf16 %v2717_v24  ;;  %v2718_v27 = vunpack.i.l.bf16 %v2717_v24 }
 0xb16   :  { %v1609_v28 = vsel %vm621_vm15, %v1591_v53, %v2719_v26  ;;  %v1608_v29 = vsel %vm621_vm15, %v1589_v52, %v2718_v27  ;;  %v2793_v53 = vld [vmem:[%s4070_s15] sm:$0xff]   ;;  %v2798_v26 = vld [vmem:[%s4070_s15 + $0x28] sm:$0xff]  }
 0xb17   :  { %v1610_v30 = vpack.c.bf16 %v1609_v28, %v1608_v29 }
 0xb19   :  { %1648 = vmatmul.mubr.bf16.vlgmr.msra.gmra.mrb[20].mxu0 %v1610_v30 }
 0xb1a   :  { %2657 = vmatprep.mubr.msk.bf16.mxu0 %vm2900_vm3, %v4157_v25  ;;  %2642 = vmatpush3.bf16.msra.mxu0 %v2793_v53 }
 0xb1b   :  { %2643 = vmatprep.subr.bf16.mxu0 %v4157_v25 }
 0xb1e   :  { %2644 = vmatpush3.bf16.msra.mxu0 %v2794_v50 }
 0xb1f   :  { %2645 = vmatprep.subr.bf16.mxu0 %v4157_v25 }
 0xb22   :  { %2646 = vmatpush3.bf16.msra.mxu0 %v2795_v51 }
 0xb23   :  { %2647 = vmatprep.subr.bf16.mxu0 %v4157_v25 }
 0xb26   :  { %2648 = vmatpush3.bf16.msra.mxu0 %v2796_v55 }
 0xb27   :  { %2649 = vmatprep.subr.bf16.mxu0 %v4157_v25 }
 0xb2a   :  { %2650 = vmatpush3.bf16.msra.mxu0 %v2797_v57 }
 0xb2b   :  { %2651 = vmatprep.subr.bf16.mxu0 %v4157_v25 }
 0xb2e   :  { %2652 = vmatpush3.bf16.msra.mxu0 %v2798_v26 }
 0xb2f   :  { %2653 = vmatprep.subr.bf16.mxu0 %v4157_v25 }
 0xbec   :  { %v1649_v61 = vpop.f32.mrb[20].mxu0 }
 0xbed   :  { %v1650_v5 = vadd.f32 %v3666_v13, %v1649_v61  ;;  %v1651_v6 = vpop.f32.mrb[21].mxu0 }
 0xbee   :  { %v1652_v8 = vpop.f32.mrb[22].mxu0 }
 0xbef   :  { %vm1656_vm11 = vcmp.gt.f32.partialorder %v1650_v5, 0.0  ;;  %v1658_v9 = vmul.f32 0.01, %v1650_v5  ;;  %v1653_v58 = vadd.f32 %v3666_v13, %v1652_v8  ;;  %v1654_v59 = vpop.f32.mrb[23].mxu0 }
 0xbf1   :  { %v1660_v62 = vsel %vm1656_vm11, %v1650_v5, %v1658_v9  ;;  %vm1657_vm13 = vcmp.gt.f32.partialorder %v1653_v58, 0.0  ;;  %v1659_v0 = vmul.f32 0.01, %v1653_v58 }
 0xbf2   :  { %v1670_v2 = vrot.slane %v1660_v62, 2  ;;  %v1664_v19 = vrot.slane %v1660_v62, 1 }
 0xbf3   :  { %v1661_v38 = vsel %vm1657_vm13, %v1653_v58, %v1659_v0 }
 0xbf4   :  { %v1665_v12 = vrot.slane %v1661_v38, 1  ;;  %v1671_v21 = vrot.slane %v1661_v38, 2 }
 0xbf6   :  { %v1666_v36 = vsel %vm231_vm0, %v1664_v19, %v1665_v12  ;;  %v1672_v39 = vsel %vm238_vm1, %v1670_v2, %v1671_v21  ;;  %vm1230_vm0 = vcmask 1048064   ;;  %vm1930_vm1 = vcmask 261120  }
 0xbf7   :  { %1667 = vrot.lane.b32.xlu1 %v1666_v36, %s2903_s7  ;;  %v1676_v13 = vpack.c.bf16 %v1672_v39, %v1672_v39  ;;  %v2801_v39 = vld [vmem:[%s4071_s16] sm:$0xff]  }
 0xbf9   :  { %2444 = vmatprep.mubr.msk.bf16.mxu1 %vm621_vm15, %v1676_v13  ;;  %v2802_v13 = vld [vmem:[%s4071_s16 + $0x8] sm:$0xff]  }
 0xbfb   :  { %1189 = vrot.lane.b32.xlu1 %v2848_v22, %s2903_s7 }
 0xbff   :  { %1783 = vrot.lane.b32.xlu1 %v1777_v14, %s2903_s7 }
 0xc03   :  { %1252 = vrot.lane.b32.xlu1 %v1246_v20, %s2903_s7 }
 0xc69   :  { %v1668_v49 = vpop.permute.xlu1 %1667 }
 0xc6a   :  { %v1674_v23 = vsel %vm621_vm15, %v1660_v62, %v1668_v49 }
 0xc6b   :  { %v1675_v11 = vpack.c.bf16 %v1674_v23, %v1674_v23 }
 0xc6d   :  { %1713 = vmatmul.mubr.bf16.vlgmr.msra.gmra.mrb[28].mxu1 %v1675_v11  ;;  %v1190_v17 = vpop.permute.xlu1 %1189 }
 0xc6e   :  { %2665 = vmatprep.mubr.msk.bf16.mxu1 %vm2900_vm3, %v4157_v25  ;;  %v1192_v54 = vsub.f32 %v4191_v45, %v1190_v17  ;;  %2662 = vmatpush3.bf16.msra.mxu1 %v2801_v39  ;;  %v2821_v39 = vld [vmem:[%s4072_s17 + $0x60] ss:$8 sps:$4 sm:$0xff]  }
 0xc6f   :  { %2663 = vmatprep.subr.bf16.mxu1 %v4157_v25 }
 0xc70   :  { %v1231_v56 = vsel %vm1230_vm0, %v1192_v54, 0.0  ;;  %v1193_v60 = vand.u32 2147483647, %v1192_v54 }
 0xc71   :  { %v1232_v24 = vrot.slane %v1231_v56, 4  ;;  %v1784_v62 = vpop.permute.xlu1 %1783 }
 0xc72   :  { %2664 = vmatpush3.bf16.msra.mxu1 %v2802_v13  ;;  %v2826_v13 = vld [vmem:[%s4072_s17 + $0x74] ss:$8 sps:$4 sm:$0xff]  }
 0xc73   :  { %v1233_v27 = vadd.f32 %v1232_v24, %v1231_v56 }
 0xc75   :  { %v1234_v34 = vrot.slane %v1233_v27, 2  ;;  %v1253_v38 = vpop.permute.xlu1 %1252 }
 0xc77   :  { %v1235_v43 = vadd.f32 %v1234_v34, %v1233_v27 }
 0xc79   :  { %v1236_v7 = vrot.slane %v1235_v43, 1 }
 0xc7b   :  { %v1237_v58 = vadd.f32 %v1236_v7, %v1235_v43 }
 0xc7d   :  { %v1239_v59 = vmul.f32 0.125, %v1237_v58 }
 0xd40   :  { %v1714_v46 = vpop.f32.mrb[28].mxu1 }
 0xd41   :  { %v1715_v48 = vadd.f32 %v2419_v40, %v1714_v46  ;;  %v1716_v44 = vpop.f32.mrb[29].mxu1  ;;  %v2799_v40 = vld [vmem:[%s4070_s15 + $0x30] sm:$0xff]  }
 0xd42   :  { %v1717_v47 = vpop.f32.mrb[30].mxu1  ;;  %2654 = vmatpush3.bf16.msra.mxu0 %v2799_v40 }
 0xd43   :  { %2849 = vtanh.f32 %v1715_v48  ;;  %v1718_v16 = vpop.f32.mrb[31].mxu1  ;;  %2655 = vmatprep.subr.bf16.mxu0 %v4157_v25 }
 0xd46   :  { %2656 = vmatpush3.bf16.msra.mxu0 %v2800_v3 }
 0xd4d   :  { %v2850_v52 = vpop.eup %2849 }
 0xd4e   :  { %1722 = vrot.lane.b32.xlu0 %v2850_v52, %s2903_s7 }
 0xdc0   :  { %v1723_v28 = vpop.permute.xlu0 %1722 }
 0xdc1   :  { %v1725_v29 = vsub.f32 %v3754_v63, %v1723_v28 }
 0xdc3   :  { %v1726_v30 = vand.u32 2147483647, %v1725_v29  ;;  %v1763_v32 = vsel %vm1230_vm0, %v1725_v29, 0.0 }
 0xdc4   :  { %v1764_v37 = vrot.slane %v1763_v32, 4 }
 0xdc5   :  { %1728 = vrot.lane.b32.xlu1 %v1726_v30, %s2903_s7 }
 0xdc6   :  { %v1765_v41 = vadd.f32 %v1764_v37, %v1763_v32 }
 0xdc8   :  { %v1766_v61 = vrot.slane %v1765_v41, 2 }
 0xdca   :  { %v1767_v5 = vadd.f32 %v1766_v61, %v1765_v41 }
 0xdcc   :  { %v1768_v6 = vrot.slane %v1767_v5, 1 }
 0xdce   :  { %v1769_v8 = vadd.f32 %v1768_v6, %v1767_v5 }
 0xdd0   :  { %v1770_v9 = vmul.f32 0.125, %v1769_v8 }
 0xdd2   :  { %1779 = vrot.lane.b32.xlu0 %v1770_v9, %s2903_s7 }
 0xdd6   :  { %1248 = vrot.lane.b32.xlu0 %v1239_v59, %s2903_s7 }
 0xdda   :  { %1195 = vrot.lane.b32.xlu0 %v1193_v60, %s2903_s7 }
 0xde9   :  { %1210 = vadd.xlane.f32.xlu1 %v3846_v35 }
 0xded   :  { %1743 = vadd.xlane.f32.xlu1 %v3841_v31 }
 0xe37   :  { %v1729_v31 = vpop.permute.xlu1 %1728 }
 0xe38   :  { %v1731_v36 = vsel %vm621_vm15, %v1729_v31, 0.0  ;;  %v2818_v31 = vld [vmem:[%s4072_s17 + $0x50] ss:$8 sps:$4 sm:$0xff]  }
 0xe44   :  { %v1780_v0 = vpop.permute.xlu0 %1779 }
 0xe45   :  { %v1786_v1 = vsel %vm621_vm15, %v1780_v0, %v1784_v62  ;;  %v2805_v62 = vld [vmem:[%s4072_s17 + $0x4] ss:$8 sps:$4 sm:$0xff]   ;;  %v2803_v0 = vld [vmem:[%s4072_s17] ss:$8 sps:$4 sm:$0xff]  }
 0xe46   :  { %v1804_v2 = vrot.slane %v1786_v1, 7  ;;  %2089 = vmatprep.subr.bf16.mxu1 %v2805_v62  ;;  %v2806_v1 = vld [vmem:[%s4072_s17 + $0x10] ss:$8 sps:$4 sm:$0xff]  }
 0xe48   :  { %v1249_v12 = vpop.permute.xlu0 %1248 }
 0xe49   :  { %v1255_v21 = vsel %vm621_vm15, %v1249_v12, %v1253_v38  ;;  %v2811_v38 = vld [vmem:[%s4072_s17 + $0x24] ss:$8 sps:$4 sm:$0xff]   ;;  %v2814_v12 = vld [vmem:[%s4072_s17 + $0x34] ss:$8 sps:$4 sm:$0xff]  }
 0xe4a   :  { %v3912_v19 = vsel %vm329_vm9, %v1255_v21, %v1804_v2  ;;  %v2809_v2 = vld [vmem:[%s4072_s17 + $0x20] ss:$8 sps:$4 sm:$0xff]   ;;  %v2812_v21 = vld [vmem:[%s4072_s17 + $0x30] ss:$8 sps:$4 sm:$0xff]  }
 0xe4b   :  { %v1823_v15 = vpack.c.bf16 %v3912_v19, %v3912_v19 }
 0xe4c   :  { %v1196_v33 = vpop.permute.xlu0 %1195 }
 0xe4d   :  { %2658 = vmatmul.mubr.bf16.vlgmr.msra.gmra.mrb[24].mxu0 %v1823_v15  ;;  %v1198_v35 = vsel %vm621_vm15, %v1196_v33, 0.0  ;;  %v2817_v15 = vld [vmem:[%s4072_s17 + $0x44] ss:$8 sps:$4 sm:$0xff]   ;;  %v2815_v33 = vld [vmem:[%s4072_s17 + $0x40] ss:$8 sps:$4 sm:$0xff]  }
 0xe4e   :  { %1199 = vadd.xlane.f32.xlu0 %v1198_v35  ;;  %v2820_v35 = vld [vmem:[%s4072_s17 + $0x54] ss:$8 sps:$4 sm:$0xff]  }
 0xe52   :  { %1220 = vadd.xlane.f32.xlu0 %v4191_v45 }
 0xe56   :  { %1732 = vadd.xlane.f32.xlu0 %v1731_v36  ;;  %v2823_v36 = vld [vmem:[%s4072_s17 + $0x64] ss:$8 sps:$4 sm:$0xff]  }
 0xe5a   :  { %1753 = vadd.xlane.f32.xlu0 %v3754_v63 }
 0xe76   :  { %v1211_v42 = vpop.xlane.xlu1 %1210 }
 0xe77   :  { %v1212_v18 = vrot.slane %v1211_v42, 4 }
 0xe79   :  { %v1213_v22 = vadd.f32 %v1212_v18, %v1211_v42  ;;  %v2824_v42 = vld [vmem:[%s4072_s17 + $0x70] ss:$8 sps:$4 sm:$0xff]   ;;  %v2827_v18 = vld [vmem:[%s4074_s19 + $0x40] sm:$0xff]  }
 0xe7a   :  { %v1744_v14 = vpop.xlane.xlu1 %1743  ;;  %2567 = vmatprep.subr.bf16.mxu0 %v2827_v18 }
 0xe7b   :  { %v1214_v10 = vrot.slane %v1213_v22, 2  ;;  %v1745_v20 = vrot.slane %v1744_v14, 4 }
 0xe7d   :  { %v1746_v11 = vadd.f32 %v1745_v20, %v1744_v14  ;;  %v1215_v48 = vadd.f32 %v1214_v10, %v1213_v22  ;;  %v2828_v22 = vld [vmem:[%s4074_s19] sm:$0xff]   ;;  %v2829_v14 = vld [vmem:[%s4074_s19 + $0x48] sm:$0xff]   ;;  %v2831_v20 = vld [vmem:[%s4074_s19 + $0x50] sm:$0xff]  }
 0xe7e   :  { %2568 = vmatpush3.bf16.msra.mxu0 %v2828_v22  ;;  %v2830_v10 = vld [vmem:[%s4074_s19 + $0x8] sm:$0xff]  }
 0xe7f   :  { %v1747_v52 = vrot.slane %v1746_v11, 2  ;;  %v1216_v50 = vrot.slane %v1215_v48, 1  ;;  %2569 = vmatprep.subr.bf16.mxu0 %v2829_v14 }
 0xe81   :  { %v1748_v57 = vadd.f32 %v1747_v52, %v1746_v11  ;;  %v1217_v26 = vadd.f32 %v1216_v50, %v1215_v48  ;;  %v2835_v11 = vld [vmem:[%s4074_s19 + $0x60] sm:$0xff]   ;;  %v2837_v48 = vld [vmem:[%s4074_s19 + $0x68] sm:$0xff]  }
 0xe82   :  { %2570 = vmatpush3.bf16.msra.mxu0 %v2830_v10 }
 0xe83   :  { %v1749_v37 = vrot.slane %v1748_v57, 1  ;;  %2571 = vmatprep.subr.bf16.mxu0 %v2831_v20 }
 0xe85   :  { %v1750_v3 = vadd.f32 %v1749_v37, %v1748_v57  ;;  %v2840_v57 = vld [vmem:[%s4074_s19 + $0x30] sm:$0xff]  }
 0xedb   :  { %v1200_v49 = vpop.xlane.xlu0 %1199 }
 0xedc   :  { %v1201_v63 = vrot.slane %v1200_v49, 4 }
 0xede   :  { %v1202_v23 = vadd.f32 %v1201_v63, %v1200_v49  ;;  %v2832_v49 = vld [vmem:[%s4074_s19 + $0x10] sm:$0xff]   ;;  %v2833_v63 = vld [vmem:[%s4074_s19 + $0x58] sm:$0xff]  }
 0xedf   :  { %v1221_v46 = vpop.xlane.xlu0 %1220  ;;  %2572 = vmatpush3.bf16.msra.mxu0 %v2832_v49 }
 0xee0   :  { %v1203_v44 = vrot.slane %v1202_v23, 2  ;;  %v1222_v47 = vrot.slane %v1221_v46, 4  ;;  %2573 = vmatprep.subr.bf16.mxu0 %v2833_v63 }
 0xee2   :  { %v1223_v25 = vadd.f32 %v1222_v47, %v1221_v46  ;;  %v1204_v16 = vadd.f32 %v1203_v44, %v1202_v23  ;;  %v2834_v23 = vld [vmem:[%s4074_s19 + $0x18] sm:$0xff]   ;;  %v2836_v46 = vld [vmem:[%s4074_s19 + $0x20] sm:$0xff]   ;;  %v2838_v44 = vld [vmem:[%s4074_s19 + $0x28] sm:$0xff]  }
 0xee3   :  { %v1733_v53 = vpop.xlane.xlu0 %1732  ;;  %2574 = vmatpush3.bf16.msra.mxu0 %v2834_v23 }
 0xee4   :  { %v1224_v51 = vrot.slane %v1223_v25, 2  ;;  %v1734_v17 = vrot.slane %v1733_v53, 4  ;;  %v1205_v45 = vrot.slane %v1204_v16, 1  ;;  %2575 = vmatprep.subr.bf16.mxu0 %v2835_v11 }
 0xee6   :  { %v1735_v54 = vadd.f32 %v1734_v17, %v1733_v53  ;;  %v1206_v55 = vadd.f32 %v1205_v45, %v1204_v16  ;;  %v1225_v56 = vadd.f32 %v1224_v51, %v1223_v25 }
 0xee7   :  { %v1754_v24 = vpop.xlane.xlu0 %1753  ;;  %2576 = vmatpush3.bf16.msra.mxu0 %v2836_v46 }
 0xee8   :  { %v1736_v27 = vrot.slane %v1735_v54, 2  ;;  %v1755_v28 = vrot.slane %v1754_v24, 4  ;;  %2669 = vpush %v1206_v55  ;;  %v1226_v29 = vrot.slane %v1225_v56, 1  ;;  %2577 = vmatprep.subr.bf16.mxu0 %v2837_v48 }
 0xee9   :  { %2671 = vpush %v1217_v26  ;;  %v1999_v26 = vlaneseq }
 0xeea   :  { %v1756_v30 = vadd.f32 %v1755_v28, %v1754_v24  ;;  %v1227_v32 = vadd.f32 %v1226_v29, %v1225_v56  ;;  %v1737_v34 = vadd.f32 %v1736_v27, %v1735_v54  ;;  %v2839_v56 = vld [vmem:[%s4074_s19 + $0x70] sm:$0xff]   ;;  %v2841_v24 = vld [vmem:[%s4074_s19 + $0x78] sm:$0xff]   ;;  %v1997_v29 = vld [vmem:[%s4073_s18] sm:$0x3] }
 0xeeb   :  { %2578 = vmatpush3.bf16.msra.mxu0 %v2838_v44  ;;  %v2000_v27 = vshrl.u32 %v1999_v26, 7 }
 0xeec   :  { %v1757_v40 = vrot.slane %v1756_v30, 2  ;;  %2673 = vpush %v1227_v32  ;;  %v1738_v41 = vrot.slane %v1737_v34, 1  ;;  %2579 = vmatprep.subr.bf16.mxu0 %v2839_v56 }
 0xeed   :  { %v2001_v28 = vsub.s32 0, %v2000_v27 }
 0xeee   :  { %v1758_v43 = vadd.f32 %v1757_v40, %v1756_v30  ;;  %v1739_v61 = vadd.f32 %v1738_v41, %v1737_v34  ;;  %v2005_v30 = vsub.s32 1, %v2000_v27 }
 0xeef   :  { %2580 = vmatpush3.bf16.msra.mxu0 %v2840_v57  ;;  %v2002_v32 = vrot.slane %v1997_v29, %v2001_v28 }
 0xef0   :  { %2675 = vpush %v1739_v61  ;;  %v1759_v5 = vrot.slane %v1758_v43, 1  ;;  %2581 = vmatprep.subr.bf16.mxu0 %v2841_v24  ;;  %v2006_v34 = vrot.slane %v1997_v29, %v2005_v30 }
 0xef1   :  { %2677 = vpush %v1750_v3 }
 0xef2   :  { %v1760_v6 = vadd.f32 %v1759_v5, %v1758_v43 }
 0xef4   :  { %2679 = vpush %v1760_v6 }
 0xf19   :  { %s2670_s16 = spop %2669 }
 0xf1a   :  { %s2672_s29 = spop %2671 }
 0xf1d   :  { %s2674_s25 = spop %2673 }
 0xf20   :  { %v1906_v7 = vpop.f32.mrb[24].mxu0 }
 0xf21   :  { %v1912_v8 = vmax.f32 %v1906_v7, 0.0  ;;  %s2676_s12 = spop %2675  ;;  %v2659_v9 = vpop.f32.mrb[25].mxu0 }
 0xf22   :  { %s1741_s13 = sadd.f32 %s2676_s12, %s2670_s16  ;;  %s2678_s14 = spop %2677  ;;  %v1909_v58 = vpop.f32.mrb[26].mxu0 }
 0xf23   :  { %v1917_v59 = vpack.c.bf16 %v1912_v8, %v1912_v8  ;;  %s1752_s6 = sadd.f32 %s2678_s14, %s2672_s29  ;;  %v2660_v60 = vpop.f32.mrb[27].mxu0 }
 0xf24   :  { %s1789_s3 = smul.f32 0.0009765625, %s1741_s13 }
 0xf25   :  { %s2680_s27 = spop %2679  ;;  %2666 = vmatmul.mubr.msk.bf16.vlgmr.msra.gmra.mrb[32].mxu1 %vm1930_vm1, %v1917_v59  ;;  %s1793_s4 = smul.f32 0.0009765625, %s1752_s6 }
 0xf26   :  { %s1762_s1 = sadd.f32 %s2680_s27, %s2674_s25  ;;  %2121 = vmatprep.mubr.bf16.mxu1 %v4144_v4  ;;  %s1790_s5 = smul.f32 0.01, %s1789_s3  ;;  %2090 = vmatpush1.bf16.msra.mxu1 %v2803_v0  ;;  %v2808_v4 = vld [vmem:[%s4072_s17 + $0x14] ss:$8 sps:$4 sm:$0xff]  }
 0xf27   :  { %2091 = vmatprep.subr.bf16.mxu1 %v2808_v4  ;;  %s2861_s17 = scalar_lea.hbm %s4077_s22, 16 }
 0xf28   :  { %s1796_s0 = smul.f32 0.00048828125, %s1762_s1  ;;  %p2862_p0 = scmp.ne.s32.totalorder %s4077_s22, %s2861_s17 }
 0xf29   :  { %p2865_p1 = scmp.lt.u32.totalorder %s2861_s17, %s4077_s22 }
 0xf2a   :  { %s1797_s23 = ssub.f32 %s1793_s4, %s1796_s0  ;;  %2092 = vmatpush1.bf16.msra.mxu1 %v2806_v1 }
 0xf2b   :  { %2093 = vmatprep.subr.bf16.mxu1 %v2811_v38  ;;  %p2867_p2 = pnand %p2865_p1, %p2862_p0 }
 0xf2c   :  { %s1798_s24 = sand.u32 2147483647, %s1797_s23 }
 0xf2d   :  { %s1799_s8 = smul.f32 0.01, %s1798_s24 }
 0xf2e   :  { %2094 = vmatpush1.bf16.msra.mxu1 %v2809_v2 }
 0xf2f   :  { %s1800_s9 = sadd.f32 %s1799_s8, %s1790_s5  ;;  %2095 = vmatprep.subr.bf16.mxu1 %v2814_v12 }
 0xf31   :  { %1802 = sst [smem:[#allocation5]] %s1800_s9 }
 0xf32   :  { %2096 = vmatpush1.bf16.msra.mxu1 %v2812_v21 }
 0xf33   :  { %2097 = vmatprep.subr.bf16.mxu1 %v2817_v15 }
 0xf36   :  { %2098 = vmatpush1.bf16.msra.mxu1 %v2815_v33 }
 0xf37   :  { %2099 = vmatprep.subr.bf16.mxu1 %v2820_v35 }
 0xf3a   :  { %2100 = vmatpush1.bf16.msra.mxu1 %v2818_v31 }
 0xf3b   :  { %2101 = vmatprep.subr.bf16.mxu1 %v2823_v36 }
 0xf3e   :  { %2102 = vmatpush1.bf16.msra.mxu1 %v2821_v39 }
 0xf3f   :  { %2103 = vmatprep.subr.bf16.mxu1 %v2826_v13 }
 0xf42   :  { %2104 = vmatpush1.bf16.msra.mxu1 %v2824_v42 }
 0xff8   :  { %v1968_v47 = vpop.f32.mrb[32].mxu1 }
 0xff9   :  { %v1974_v25 = vsub.f32 0.0, %v1968_v47  ;;  %v2667_v16 = vpop.f32.mrb[33].mxu1 }
 0xffa   :  { %v1971_v52 = vpop.f32.mrb[34].mxu1 }
 0xffb   :  { %v1975_v53 = vmul.f32 1.442695, %v1974_v25  ;;  %v2668_v50 = vpop.f32.mrb[35].mxu1 }
 0xffd   :  { %2851 = vpow2.f32 %v1975_v53 }
0x1007   :  { %v2852_v51 = vpop.eup %2851 }
0x1008   :  { %v1977_v17 = vadd.f32 1.0, %v2852_v51 }
0x100a   :  { %2853 = vrcp.f32 %v1977_v17 }
0x1014   :  { %v2854_v45 = vpop.eup %2853 }
0x1015   :  { %v1979_v54 = vmul.f32 %v2854_v45, %v3912_v19  ;;  %v2842_v19 = vld [vmem:[%s4074_s19 + $0x38] sm:$0xff]  }
0x1016   :  { %2582 = vmatpush3.bf16.msra.mxu0 %v2842_v19 }
0x1017   :  { %v1996_v55 = vpack.c.bf16 %v1979_v54, %v1979_v54 }
0x1019   :  { %2122 = vmatmul.mubr.bf16.vlgmr.msra.gmra.mrb[36].mxu1 %v1996_v55 }
0x10ec   :  { %v2123_v37 = vpop.f32.mrb[36].mxu1 }
0x10ed   :  { %v2124_v40 = vadd.f32 %v2123_v37, %v2002_v32  ;;  %v2125_v41 = vpop.f32.mrb[37].mxu1 }
0x10ee   :  { %v2126_v43 = vadd.f32 %v2125_v41, %v2006_v34  ;;  %v2127_v61 = vpop.f32.mrb[38].mxu1 }
0x10ef   :  { %vm2130_vm3 = vcmp.gt.f32.partialorder %v2124_v40, 0.0  ;;  %v2132_v3 = vmul.f32 0.01, %v2124_v40  ;;  %v2128_v5 = vpop.f32.mrb[39].mxu1 }
0x10f0   :  { %vm2131_vm9 = vcmp.gt.f32.partialorder %v2126_v43, 0.0  ;;  %v2133_v6 = vmul.f32 0.01, %v2126_v43 }
0x10f1   :  { %v2134_v7 = vsel %vm2130_vm3, %v2124_v40, %v2132_v3 }
0x10f2   :  { %v2135_v8 = vsel %vm2131_vm9, %v2126_v43, %v2133_v6  ;;  %v2168_v58 = vpack.c.bf16 %v2134_v7, %v2134_v7 }
0x10f3   :  { %v2169_v9 = vpack.c.bf16 %v2135_v8, %v2135_v8 }
0x10f5   :  { %2305 = vmatprep.mubr.bf16.mxu0 %v2169_v9 }
0x10f6   :  { %2306 = vmatmul.mubr.bf16.vlgmr.msra.gmra.mrb[28].mxu0 %v2168_v58 }
0x10f7   :  { %2870 = shalt.err (!%p2867_p2)
}
0x10f8   :  { %s2904_s0 = smov [#allocation5]   ;;  %v2472_v62 = vld [vmem:[%s4075_s20] ss:$0 sm:$0xff]  ;;  %s2905_s9 = smov [#allocation2]   ;;  %vm2313_vm14 = vcmask 74752  }
0x10f9   :  { %2332 = dma.smem_to_hbm %s2904_s0, 16, %s4077_s22, [#allocation4]  }
0x10fa   :  { %s2321_s26 = sshll.u32 %s2905_s9, 4  ;;  %s2322_s26 = int_to_ptr.vmem [resolvable:$true] %s2321_s26 }
0x10fb   :  { %s2871_s2 = scalar_lea.vmem %s2322_s26, 32  ;;  %p2876_p4 = scmp.lt.s32.totalorder %s2322_s26, %s2322_s26 }
0x10fc   :  { %p2872_p3 = scmp.ne.s32.totalorder %s2322_s26, %s2871_s2  ;;  %p2877_p5 = scmp.lt.s32.totalorder %s2871_s2, %s2871_s2 }
0x10fe   :  { %p2878_p6 = por %p2877_p5, %p2876_p4 }
0x1100   :  { %p2879_p7 = pnand %p2878_p6, %p2872_p3 }
0x11c9   :  { %v2583_v59 = vpop.f32.mrb[28].mxu0 }
0x11ca   :  { %v2584_v60 = vpop.f32.mrb[29].mxu0 }
0x11cb   :  { %v2585_v0 = vadd.f32 %v2584_v60, %v2583_v59  ;;  %v2586_v4 = vpop.f32.mrb[30].mxu0 }
0x11cc   :  { %v2587_v1 = vpop.f32.mrb[31].mxu0 }
0x11cd   :  { %v2308_v38 = vadd.f32 %v2585_v0, %v2472_v62 }
0x11cf   :  { %2314 = vst.msk [vmem:[#allocation2] sm:$0x3] %vm2313_vm14, %v2308_v38 }
0x11d0   :  { %2882 = shalt.err (!%p2879_p7)
}
0x11d1   :  { %s2883_s20 = scalar_lea.hbm %s4076_s21, 32 }
0x11d2   :  { %p2884_p8 = scmp.ne.s32.totalorder %s4076_s21, %s2883_s20  ;;  %p2887_p9 = scmp.lt.u32.totalorder %s2883_s20, %s4076_s21 }
0x11d4   :  { %p2889_p10 = pnand %p2887_p9, %p2884_p8 }
0x11d6   :  { %2892 = shalt.err (!%p2889_p10)
}
0x11d7   :  { %2324 = dma.vmem_to_hbm [thread:$0]  %s2322_s26, 32, %s4076_s21, [#allocation3]  }
0x11d8   :  { %2893 = dma.done.wait [#allocation3], 32  }
0x11d9   :  { %2894 = vsyncadd [#allocation3], 4294967264 }
0x11da   :  { %2895 = dma.done.wait [#allocation4], 16  }
0x11db   :  { %2896 = vsyncadd [#allocation4], 4294967280 }
0x11dc   :  { %2339 = sfence }
0x11dd   :  { %2340 = vsyncpa [#allocation3], 1 }
0x11de   :  { %2341 = vsyncpa [#allocation4], 1 }

</bundles_post_ra>
